<compile_context>
chip_gen: v6e
topology: v6e:2x2x1
jax: 0.10.0
libtpu: 0.0.40
codegen_flags: <defaults>
</compile_context>

<pallas_src>
import functools

import jax
import jax.numpy as jnp
from jax.experimental import pallas as pl
from jax.experimental.pallas import tpu as pltpu


def _round_up(x, m):
    return ((x + m - 1) // m) * m


# -----------------------------------------------------------------------------
# Pallas kernel #1: tiled fused matmul + bias (+ optional ReLU).
#   bf16 operands on the MXU, f32 VMEM accumulator, bias/ReLU applied once at
#   the final K step, lane-dense (N padded to 128) output store.
# -----------------------------------------------------------------------------
def _mm_bias_kernel(x_ref, w_ref, b_ref, o_ref, acc_ref, *, relu):
    @pl.when(pl.program_id(2) == 0)
    def _():
        acc_ref[...] = jnp.zeros_like(acc_ref)

    acc_ref[...] += jnp.dot(x_ref[...], w_ref[...],
                            preferred_element_type=jnp.float32)

    @pl.when(pl.program_id(2) == pl.num_programs(2) - 1)
    def _():
        out = acc_ref[...] + b_ref[...]
        if relu:
            out = jnp.maximum(out, 0.0)
        o_ref[...] = out.astype(o_ref.dtype)


def matmul_bias(x, w, b, relu=False, tm_pref=512, tn_pref=256, tk_pref=512):
    """x: (M, K)  w: (K, N)  b: (N,)  ->  (M, N) float32 via tiled Pallas MXU kernel."""
    M, K = x.shape
    K2, N = w.shape
    assert K == K2
    # Tile sizes: biggest that keeps (2 inputs x 2 buffers + f32 acc) small
    # relative to VMEM on every generation (v7x = 64 MiB is the tight one).
    tm = tm_pref if M > tm_pref else _round_up(M, 16)
    tn = tn_pref if N > tn_pref else _round_up(N, 128)
    tk = tk_pref if K > tk_pref else _round_up(K, 128)
    Mp, Np, Kp = _round_up(M, tm), _round_up(N, tn), _round_up(K, tk)

    xb = jnp.pad(x.astype(jnp.bfloat16), ((0, Mp - M), (0, Kp - K)))
    wb = jnp.pad(w.astype(jnp.bfloat16), ((0, Kp - K), (0, Np - N)))
    bb = jnp.pad(b.astype(jnp.float32), (0, Np - N)).reshape(1, Np)

    kernel = functools.partial(_mm_bias_kernel, relu=relu)
    out = pl.pallas_call(
        kernel,
        out_shape=jax.ShapeDtypeStruct((Mp, Np), jnp.float32),
        grid_spec=pltpu.PrefetchScalarGridSpec(
            num_scalar_prefetch=0,
            grid=(Mp // tm, Np // tn, Kp // tk),
            in_specs=[
                pl.BlockSpec((tm, tk), lambda i, j, k: (i, k)),
                pl.BlockSpec((tk, tn), lambda i, j, k: (k, j)),
                pl.BlockSpec((1, tn), lambda i, j, k: (0, j)),
            ],
            out_specs=pl.BlockSpec((tm, tn), lambda i, j, k: (i, j)),
            scratch_shapes=[pltpu.VMEM((tm, tn), jnp.float32)],
        ),
        compiler_params=pltpu.CompilerParams(
            dimension_semantics=("parallel", "parallel", "arbitrary"),
            vmem_limit_bytes=48 * 1024 * 1024,
        ),
    )(xb, wb, bb)
    return out[:M, :N]


# -----------------------------------------------------------------------------
# Pallas kernel #2: fused RCNN tail.
#   flat -> fc1(relu) -> fc2(relu) -> [cls_fc | bbox_fc] in ONE launch.
#   Weights stay VMEM-resident; only the rows (R) axis is tiled / parallel.
# -----------------------------------------------------------------------------
def _rcnn_head_kernel(x_ref, w1_ref, b1_ref, w2_ref, b2_ref, wh_ref, bh_ref, o_ref):
    h1 = jnp.dot(x_ref[...], w1_ref[...], preferred_element_type=jnp.float32) + b1_ref[...]
    h1 = jnp.maximum(h1, 0.0)
    h2 = jnp.dot(h1.astype(w2_ref.dtype), w2_ref[...],
                 preferred_element_type=jnp.float32) + b2_ref[...]
    h2 = jnp.maximum(h2, 0.0)
    out = jnp.dot(h2.astype(wh_ref.dtype), wh_ref[...],
                  preferred_element_type=jnp.float32) + bh_ref[...]
    o_ref[...] = out.astype(o_ref.dtype)


def rcnn_heads_pallas(flat, w1, b1, w2, b2, wh, bh, tr_pref=256):
    R, K = flat.shape
    D = w1.shape[1]
    Nh = wh.shape[1]
    Rp0 = _round_up(R, 16)
    tr = tr_pref if Rp0 > tr_pref else Rp0
    Rp = _round_up(Rp0, tr)
    Kp = _round_up(K, 128)
    Dp = _round_up(D, 128)
    Np = _round_up(Nh, 128)

    bf = jnp.bfloat16
    xz = jnp.pad(flat.astype(bf), ((0, Rp - R), (0, Kp - K)))
    w1z = jnp.pad(w1.astype(bf), ((0, Kp - K), (0, Dp - D)))
    b1z = jnp.pad(b1.astype(jnp.float32), (0, Dp - D)).reshape(1, Dp)
    w2z = jnp.pad(w2.astype(bf), ((0, Dp - D), (0, Dp - D)))
    b2z = jnp.pad(b2.astype(jnp.float32), (0, Dp - D)).reshape(1, Dp)
    whz = jnp.pad(wh.astype(bf), ((0, Dp - D), (0, Np - Nh)))
    bhz = jnp.pad(bh.astype(jnp.float32), (0, Np - Nh)).reshape(1, Np)

    out = pl.pallas_call(
        _rcnn_head_kernel,
        out_shape=jax.ShapeDtypeStruct((Rp, Np), jnp.float32),
        grid=(Rp // tr,),
        in_specs=[
            pl.BlockSpec((tr, Kp), lambda i: (i, 0)),
            pl.BlockSpec((Kp, Dp), lambda i: (0, 0)),
            pl.BlockSpec((1, Dp), lambda i: (0, 0)),
            pl.BlockSpec((Dp, Dp), lambda i: (0, 0)),
            pl.BlockSpec((1, Dp), lambda i: (0, 0)),
            pl.BlockSpec((Dp, Np), lambda i: (0, 0)),
            pl.BlockSpec((1, Np), lambda i: (0, 0)),
        ],
        out_specs=pl.BlockSpec((tr, Np), lambda i: (i, 0)),
        compiler_params=pltpu.CompilerParams(
            dimension_semantics=("parallel",)),
    )(xz, w1z, b1z, w2z, b2z, whz, bhz)
    return out[:R, :Nh]


# -----------------------------------------------------------------------------
# Conv2d = im2col (NHWC, no transposes) + tiled Pallas matmul kernel.
# TODO(synk): im2col is still materialized by XLA (kh*kw x HBM traffic); a
#             fully fused in-kernel im2col (tap loop over pl.ds windows) is the
#             next step for large feature maps.
# -----------------------------------------------------------------------------
def _im2col_nhwc(x, kh, kw, stride, pad):
    x = jnp.pad(x, ((0, 0), (pad, pad), (pad, pad), (0, 0)))
    N, H, W, C = x.shape
    OH = (H - kh) // stride + 1
    OW = (W - kw) // stride + 1
    patches = []
    for i in range(kh):
        for j in range(kw):
            patches.append(x[:, i:i + stride * OH:stride, j:j + stride * OW:stride, :])
    cols = jnp.stack(patches, axis=3)                 # (N, OH, OW, kh*kw, C)
    return cols.reshape(N * OH * OW, kh * kw * C), OH, OW


def conv2d_pallas(x_nhwc, weight, bias, stride=1, pad=0, relu=False):
    """weight: (Cout, Cin, kh, kw) PyTorch layout.  NHWC in / NHWC out."""
    Cout, Cin, kh, kw = weight.shape
    N = x_nhwc.shape[0]
    if kh == 1 and kw == 1 and pad == 0 and stride == 1:
        H, W = x_nhwc.shape[1:3]
        cols, OH, OW = x_nhwc.reshape(N * H * W, Cin), H, W
        w_mat = weight.reshape(Cout, Cin).T
    else:
        cols, OH, OW = _im2col_nhwc(x_nhwc, kh, kw, stride, pad)
        w_mat = weight.transpose(2, 3, 1, 0).reshape(kh * kw * Cin, Cout)
    out = matmul_bias(cols, w_mat, bias, relu=relu)   # Pallas MXU kernel
    return out.reshape(N, OH, OW, Cout)


# -----------------------------------------------------------------------------
# RPN proposal generation (anchor decode + per-image top-k).  Vectorized JAX glue.
# TODO(synk): NMS of the original RPN proposal layer is omitted (no clean Pallas
#             equivalent); proposals are the top-k anchors by objectness score.
# -----------------------------------------------------------------------------
def generate_proposals(rpn_cls, rpn_bbox, im_info, feat_stride, anchor_sizes, num_props):
    # rpn_cls: (N, Hf, Wf, 2A)   rpn_bbox: (N, Hf, Wf, 4A)   -- NHWC
    N, Hf, Wf, _ = rpn_cls.shape
    A = len(anchor_sizes)
    shift_x = (jnp.arange(Wf, dtype=jnp.float32) + 0.5) * feat_stride
    shift_y = (jnp.arange(Hf, dtype=jnp.float32) + 0.5) * feat_stride
    cy, cx = jnp.meshgrid(shift_y, shift_x, indexing="ij")            # (Hf, Wf)
    sizes = jnp.asarray(anchor_sizes, jnp.float32)
    aw = jnp.broadcast_to(sizes, (Hf, Wf, A))
    ah = aw
    acx = jnp.broadcast_to(cx[:, :, None], (Hf, Wf, A))
    acy = jnp.broadcast_to(cy[:, :, None], (Hf, Wf, A))

    cls = rpn_cls.reshape(N, Hf, Wf, A, 2)
    scores = jax.nn.softmax(cls, axis=-1)[..., 1]                     # (N, Hf, Wf, A)
    deltas = rpn_bbox.reshape(N, Hf, Wf, A, 4)
    dx, dy, dw, dh = deltas[..., 0], deltas[..., 1], deltas[..., 2], deltas[..., 3]

    pcx = acx[None] + dx * aw[None]
    pcy = acy[None] + dy * ah[None]
    pw = aw[None] * jnp.exp(jnp.clip(dw, -4.0, 4.0))
    ph = ah[None] * jnp.exp(jnp.clip(dh, -4.0, 4.0))
    im_h, im_w = im_info[0], im_info[1]
    x1 = jnp.clip(pcx - pw / 2.0, 0.0, im_w - 1.0)
    y1 = jnp.clip(pcy - ph / 2.0, 0.0, im_h - 1.0)
    x2 = jnp.clip(pcx + pw / 2.0, 0.0, im_w - 1.0)
    y2 = jnp.clip(pcy + ph / 2.0, 0.0, im_h - 1.0)

    boxes = jnp.stack([x1, y1, x2, y2], axis=-1).reshape(N, -1, 4)
    scores_flat = scores.reshape(N, -1)
    _, top_idx = jax.lax.top_k(scores_flat, num_props)
    sel = jnp.take_along_axis(boxes, top_idx[..., None], axis=1)      # (N, P, 4)
    bidx = jnp.broadcast_to(
        jnp.arange(N, dtype=jnp.float32)[:, None, None], (N, num_props, 1))
    return jnp.concatenate([bidx, sel], axis=-1).reshape(N * num_props, 5)


# -----------------------------------------------------------------------------
# RoI pooling (single-sample-per-bin RoIPool).  JAX glue gather over NHWC features.
# -----------------------------------------------------------------------------
def roi_pool(features, rois, pool_size, spatial_scale):
    _, H, W, C = features.shape

    def pool_one(roi):
        b = roi[0].astype(jnp.int32)
        x1, y1 = roi[1] * spatial_scale, roi[2] * spatial_scale
        x2, y2 = roi[3] * spatial_scale, roi[4] * spatial_scale
        w = jnp.maximum(x2 - x1, 1.0)
        h = jnp.maximum(y2 - y1, 1.0)
        ys = y1 + (jnp.arange(pool_size, dtype=jnp.float32) + 0.5) * h / pool_size
        xs = x1 + (jnp.arange(pool_size, dtype=jnp.float32) + 0.5) * w / pool_size
        yi = jnp.clip(jnp.floor(ys).astype(jnp.int32), 0, H - 1)
        xi = jnp.clip(jnp.floor(xs).astype(jnp.int32), 0, W - 1)
        feat_b = jnp.take(features, b, axis=0)                        # (H, W, C)
        return feat_b[yi[:, None], xi[None, :], :]                    # (P, P, C)

    return jax.vmap(pool_one)(rois)                                   # (R, P, P, C)


# -----------------------------------------------------------------------------
# Parameter construction (deterministic, in-script).
# -----------------------------------------------------------------------------
def init_params(key, c_in, c_feat1, c_feat2, num_anchors, rcnn_dim, nclasses, pool_size):
    ks = jax.random.split(key, 16)
    p = {}

    def nrm(k, shape, std=0.05):
        return std * jax.random.normal(k, shape, jnp.float32)

    # backbone
    p["conv1_w"] = nrm(ks[0], (c_feat1, c_in, 3, 3));              p["conv1_b"] = jnp.zeros((c_feat1,), jnp.float32)
    p["conv2_w"] = nrm(ks[1], (c_feat2, c_feat1, 3, 3));           p["conv2_b"] = jnp.zeros((c_feat2,), jnp.float32)
    # rpn
    p["rpn_conv_w"] = nrm(ks[2], (c_feat2, c_feat2, 3, 3));        p["rpn_conv_b"] = jnp.zeros((c_feat2,), jnp.float32)
    p["rpn_cls_w"] = nrm(ks[3], (2 * num_anchors, c_feat2, 1, 1)); p["rpn_cls_b"] = jnp.zeros((2 * num_anchors,), jnp.float32)
    p["rpn_bbox_w"] = nrm(ks[4], (4 * num_anchors, c_feat2, 1, 1)); p["rpn_bbox_b"] = jnp.zeros((4 * num_anchors,), jnp.float32)
    # rcnn head (two FC layers)
    fc_in = c_feat2 * pool_size * pool_size
    p["fc1_w"] = nrm(ks[5], (fc_in, rcnn_dim));                    p["fc1_b"] = jnp.zeros((rcnn_dim,), jnp.float32)
    p["fc2_w"] = nrm(ks[6], (rcnn_dim, rcnn_dim));                 p["fc2_b"] = jnp.zeros((rcnn_dim,), jnp.float32)
    # heads: normal_(0, 0.1), bias zero — matches the module __init__
    p["cls_fc_w"] = 0.1 * jax.random.normal(ks[7], (rcnn_dim, nclasses), jnp.float32)
    p["cls_fc_b"] = jnp.zeros((nclasses,), jnp.float32)
    p["bbox_fc_w"] = 0.1 * jax.random.normal(ks[8], (rcnn_dim, nclasses * 4), jnp.float32)
    p["bbox_fc_b"] = jnp.zeros((nclasses * 4,), jnp.float32)
    return p


# -----------------------------------------------------------------------------
# Full forward pass (eval mode).
# -----------------------------------------------------------------------------
def faster_rcnn_forward(params, data, im_info, *, feat_stride, anchor_sizes,
                        num_props, pool_size):
    x = data.transpose(0, 2, 3, 1)                                    # NCHW -> NHWC once

    # basic_network
    f = conv2d_pallas(x, params["conv1_w"], params["conv1_b"], stride=1, pad=1, relu=True)
    f = conv2d_pallas(f, params["conv2_w"], params["conv2_b"], stride=feat_stride, pad=1, relu=True)

    # rpn conv
    r = conv2d_pallas(f, params["rpn_conv_w"], params["rpn_conv_b"], stride=1, pad=1, relu=True)

    # fused RPN 1x1 cls + bbox heads: one lane-dense matmul
    N, Hf, Wf, Cf = r.shape
    n_cls = params["rpn_cls_w"].shape[0]
    w_rpn = jnp.concatenate(
        [params["rpn_cls_w"].reshape(n_cls, Cf),
         params["rpn_bbox_w"].reshape(params["rpn_bbox_w"].shape[0], Cf)], axis=0).T
    b_rpn = jnp.concatenate([params["rpn_cls_b"], params["rpn_bbox_b"]])
    rpn_out = matmul_bias(r.reshape(N * Hf * Wf, Cf), w_rpn, b_rpn, relu=False)
    rpn_cls = rpn_out[:, :n_cls].reshape(N, Hf, Wf, n_cls)
    rpn_bbox = rpn_out[:, n_cls:].reshape(N, Hf, Wf, -1)

    rois = generate_proposals(rpn_cls, rpn_bbox, im_info, feat_stride, anchor_sizes, num_props)

    # roi pooling (NHWC gather), flatten in PyTorch (C, P, P) order
    pooled = roi_pool(f, rois, pool_size, spatial_scale=1.0 / feat_stride)   # (R, P, P, C)
    R = pooled.shape[0]
    flat = pooled.transpose(0, 3, 1, 2).reshape(R, -1)

    # fused rcnn head + cls_fc/bbox_fc (single Pallas launch)
    nclasses = params["cls_fc_w"].shape[1]
    wh = jnp.concatenate([params["cls_fc_w"], params["bbox_fc_w"]], axis=1)
    bh = jnp.concatenate([params["cls_fc_b"], params["bbox_fc_b"]])
    out = rcnn_heads_pallas(flat, params["fc1_w"], params["fc1_b"],
                            params["fc2_w"], params["fc2_b"], wh, bh)
    cls_pred = out[:, :nclasses]
    bbox_pred = out[:, nclasses:]

    # TODO(synk): training-only build_loss (cross_entropy + smooth-L1) not implemented;
    #             forward returns (cls_pred, bbox_pred, rois) as in eval mode.
    return cls_pred, bbox_pred, rois


if __name__ == "__main__":
    # Small, deterministic configuration.
    BATCH, C_IN, H, W = 2, 4, 16, 16
    C_FEAT1, C_FEAT2 = 16, 32
    FEAT_STRIDE = 2
    ANCHOR_SIZES = (4.0, 8.0, 16.0)
    NUM_ANCHORS = len(ANCHOR_SIZES)
    NCLASSES = 5
    RCNN_DIM = 64
    POOL_SIZE = 4
    NUM_PROPS = 8      # proposals per image

    key = jax.random.PRNGKey(0)
    k_data, k_params = jax.random.split(key)
    data = jax.random.normal(k_data, (BATCH, C_IN, H, W), jnp.float32)
    im_info = jnp.array([float(H), float(W), 1.0], jnp.float32)

    params = init_params(k_params, C_IN, C_FEAT1, C_FEAT2, NUM_ANCHORS,
                         RCNN_DIM, NCLASSES, POOL_SIZE)

    fwd = jax.jit(functools.partial(
        faster_rcnn_forward,
        feat_stride=FEAT_STRIDE, anchor_sizes=ANCHOR_SIZES,
        num_props=NUM_PROPS, pool_size=POOL_SIZE))

    cls_pred, bbox_pred, rois = fwd(params, data, im_info)
    jax.block_until_ready((cls_pred, bbox_pred, rois))

    assert cls_pred.shape == (BATCH * NUM_PROPS, NCLASSES)
    assert bbox_pred.shape == (BATCH * NUM_PROPS, NCLASSES * 4)
    assert rois.shape == (BATCH * NUM_PROPS, 5)
    assert bool(jnp.all(jnp.isfinite(cls_pred))) and bool(jnp.all(jnp.isfinite(bbox_pred)))
    print("KERNEL_OK")
</pallas_src>

<mosaic_0001>
module attributes {stable_mosaic.version = 11 : i64} {
  func.func @_mm_bias_kernel(%arg0: i32, %arg1: i32, %arg2: i32, %arg3: memref<512x128xbf16, #tpu.memory_space<vmem>>, %arg4: memref<128x128xbf16, #tpu.memory_space<vmem>>, %arg5: memref<1x128xf32, #tpu.memory_space<vmem>>, %arg6: memref<512x128xf32, #tpu.memory_space<vmem>>, %arg7: memref<512x128xf32, #tpu.memory_space<vmem>>) attributes {dimension_semantics = [#tpu.dimension_semantics<parallel>, #tpu.dimension_semantics<parallel>, #tpu.dimension_semantics<arbitrary>], iteration_bounds = array<i64: 1, 1, 1>, scalar_prefetch = 0 : i64, scratch_operands = 1 : i64, tpu.core_type = #tpu.core_type<tc>, window_params = [{transform_indices = @transform_0, window_bounds = array<i64: 512, 128>}, {transform_indices = @transform_1, window_bounds = array<i64: 128, 128>}, {transform_indices = @transform_2, window_bounds = array<i64: 1, 128>}, {transform_indices = @transform_3, window_bounds = array<i64: 512, 128>}]} {
    %c0_i32 = arith.constant 0 : i32
    %0 = arith.cmpi eq, %arg2, %c0_i32 : i32
    %1 = arith.extui %0 : i1 to i32
    %c0_i32_0 = arith.constant 0 : i32
    %2 = arith.cmpi ne, %1, %c0_i32_0 : i32
    scf.if %2 {
      %cst_10 = arith.constant 0.000000e+00 : f32
      %12 = vector.broadcast %cst_10 : f32 to vector<512x128xf32>
      %c0_11 = arith.constant 0 : index
      %c0_12 = arith.constant 0 : index
      %13 = vector.load %arg7[%c0_11, %c0_12] : memref<512x128xf32, #tpu.memory_space<vmem>>, vector<512x128xf32>
      tpu.vector_store %arg7[%c0_11, %c0_12], %12 {strides = array<i32>} : memref<512x128xf32, #tpu.memory_space<vmem>>, vector<512x128xf32>,
    } else {
    }
    %c0 = arith.constant 0 : index
    %c0_1 = arith.constant 0 : index
    %3 = vector.load %arg7[%c0, %c0_1] : memref<512x128xf32, #tpu.memory_space<vmem>>, vector<512x128xf32>
    %c0_2 = arith.constant 0 : index
    %c0_3 = arith.constant 0 : index
    %4 = vector.load %arg3[%c0_2, %c0_3] : memref<512x128xbf16, #tpu.memory_space<vmem>>, vector<512x128xbf16>
    %c0_4 = arith.constant 0 : index
    %c0_5 = arith.constant 0 : index
    %5 = vector.load %arg4[%c0_4, %c0_5] : memref<128x128xbf16, #tpu.memory_space<vmem>>, vector<128x128xbf16>
    %cst = arith.constant dense<0.000000e+00> : vector<512x128xf32>
    %6 = tpu.matmul %4, %5, %cst {dimension_numbers = #tpu.dot_dimension_numbers<[1], [0], [0], [1], [0, 0, 1, 1], [], []>} : vector<512x128xbf16>, vector<128x128xbf16>, vector<512x128xf32> -> vector<512x128xf32>
    %7 = arith.addf %3, %6 : vector<512x128xf32>
    %c0_6 = arith.constant 0 : index
    %c0_7 = arith.constant 0 : index
    %8 = vector.load %arg7[%c0_6, %c0_7] : memref<512x128xf32, #tpu.memory_space<vmem>>, vector<512x128xf32>
    tpu.vector_store %arg7[%c0_6, %c0_7], %7 {strides = array<i32>} : memref<512x128xf32, #tpu.memory_space<vmem>>, vector<512x128xf32>,
    %c0_i32_8 = arith.constant 0 : i32
    %9 = arith.cmpi eq, %arg2, %c0_i32_8 : i32
    %10 = arith.extui %9 : i1 to i32
    %c0_i32_9 = arith.constant 0 : i32
    %11 = arith.cmpi ne, %10, %c0_i32_9 : i32
    scf.if %11 {
      %c0_10 = arith.constant 0 : index
      %c0_11 = arith.constant 0 : index
      %12 = vector.load %arg7[%c0_10, %c0_11] : memref<512x128xf32, #tpu.memory_space<vmem>>, vector<512x128xf32>
      %c0_12 = arith.constant 0 : index
      %c0_13 = arith.constant 0 : index
      %13 = vector.load %arg5[%c0_12, %c0_13] : memref<1x128xf32, #tpu.memory_space<vmem>>, vector<1x128xf32>
      %14 = vector.broadcast %13 : vector<1x128xf32> to vector<512x128xf32>
      %15 = arith.addf %12, %14 : vector<512x128xf32>
      %cst_14 = arith.constant 0.000000e+00 : f32
      %16 = vector.broadcast %cst_14 : f32 to vector<512x128xf32>
      %17 = arith.maximumf %15, %16 : vector<512x128xf32>
      %c0_15 = arith.constant 0 : index
      %c0_16 = arith.constant 0 : index
      %18 = vector.load %arg6[%c0_15, %c0_16] : memref<512x128xf32, #tpu.memory_space<vmem>>, vector<512x128xf32>
      tpu.vector_store %arg6[%c0_15, %c0_16], %17 {strides = array<i32>} : memref<512x128xf32, #tpu.memory_space<vmem>>, vector<512x128xf32>,
    } else {
    }
    return
  }
  func.func @transform_0(%arg0: i32, %arg1: i32, %arg2: i32) -> (i32, i32) {
    %c0_i32 = arith.constant 0 : i32
    return %arg0, %arg2 : i32, i32
  }
  func.func @transform_1(%arg0: i32, %arg1: i32, %arg2: i32) -> (i32, i32) {
    %c0_i32 = arith.constant 0 : i32
    return %arg2, %arg1 : i32, i32
  }
  func.func @transform_2(%arg0: i32, %arg1: i32, %arg2: i32) -> (i32, i32) {
    %c0_i32 = arith.constant 0 : i32
    %c0_i32_0 = arith.constant 0 : i32
    return %c0_i32, %arg1 : i32, i32
  }
  func.func @transform_3(%arg0: i32, %arg1: i32, %arg2: i32) -> (i32, i32) {
    %c0_i32 = arith.constant 0 : i32
    return %arg0, %arg1 : i32, i32
  }
}

module attributes {stable_mosaic.version = 11 : i64} {
  func.func @_mm_bias_kernel(%arg0: i32, %arg1: i32, %arg2: i32, %arg3: memref<128x256xbf16, #tpu.memory_space<vmem>>, %arg4: memref<256x128xbf16, #tpu.memory_space<vmem>>, %arg5: memref<1x128xf32, #tpu.memory_space<vmem>>, %arg6: memref<128x128xf32, #tpu.memory_space<vmem>>, %arg7: memref<128x128xf32, #tpu.memory_space<vmem>>) attributes {dimension_semantics = [#tpu.dimension_semantics<parallel>, #tpu.dimension_semantics<parallel>, #tpu.dimension_semantics<arbitrary>], iteration_bounds = array<i64: 1, 1, 1>, scalar_prefetch = 0 : i64, scratch_operands = 1 : i64, tpu.core_type = #tpu.core_type<tc>, window_params = [{transform_indices = @transform_0, window_bounds = array<i64: 128, 256>}, {transform_indices = @transform_1, window_bounds = array<i64: 256, 128>}, {transform_indices = @transform_2, window_bounds = array<i64: 1, 128>}, {transform_indices = @transform_3, window_bounds = array<i64: 128, 128>}]} {
    %c0_i32 = arith.constant 0 : i32
    %0 = arith.cmpi eq, %arg2, %c0_i32 : i32
    %1 = arith.extui %0 : i1 to i32
    %c0_i32_0 = arith.constant 0 : i32
    %2 = arith.cmpi ne, %1, %c0_i32_0 : i32
    scf.if %2 {
      %cst_10 = arith.constant 0.000000e+00 : f32
      %12 = vector.broadcast %cst_10 : f32 to vector<128x128xf32>
      %c0_11 = arith.constant 0 : index
      %c0_12 = arith.constant 0 : index
      %13 = vector.load %arg7[%c0_11, %c0_12] : memref<128x128xf32, #tpu.memory_space<vmem>>, vector<128x128xf32>
      tpu.vector_store %arg7[%c0_11, %c0_12], %12 {strides = array<i32>} : memref<128x128xf32, #tpu.memory_space<vmem>>, vector<128x128xf32>,
    } else {
    }
    %c0 = arith.constant 0 : index
    %c0_1 = arith.constant 0 : index
    %3 = vector.load %arg7[%c0, %c0_1] : memref<128x128xf32, #tpu.memory_space<vmem>>, vector<128x128xf32>
    %c0_2 = arith.constant 0 : index
    %c0_3 = arith.constant 0 : index
    %4 = vector.load %arg3[%c0_2, %c0_3] : memref<128x256xbf16, #tpu.memory_space<vmem>>, vector<128x256xbf16>
    %c0_4 = arith.constant 0 : index
    %c0_5 = arith.constant 0 : index
    %5 = vector.load %arg4[%c0_4, %c0_5] : memref<256x128xbf16, #tpu.memory_space<vmem>>, vector<256x128xbf16>
    %cst = arith.constant dense<0.000000e+00> : vector<128x128xf32>
    %6 = tpu.matmul %4, %5, %cst {dimension_numbers = #tpu.dot_dimension_numbers<[1], [0], [0], [1], [0, 0, 1, 1], [], []>} : vector<128x256xbf16>, vector<256x128xbf16>, vector<128x128xf32> -> vector<128x128xf32>
    %7 = arith.addf %3, %6 : vector<128x128xf32>
    %c0_6 = arith.constant 0 : index
    %c0_7 = arith.constant 0 : index
    %8 = vector.load %arg7[%c0_6, %c0_7] : memref<128x128xf32, #tpu.memory_space<vmem>>, vector<128x128xf32>
    tpu.vector_store %arg7[%c0_6, %c0_7], %7 {strides = array<i32>} : memref<128x128xf32, #tpu.memory_space<vmem>>, vector<128x128xf32>,
    %c0_i32_8 = arith.constant 0 : i32
    %9 = arith.cmpi eq, %arg2, %c0_i32_8 : i32
    %10 = arith.extui %9 : i1 to i32
    %c0_i32_9 = arith.constant 0 : i32
    %11 = arith.cmpi ne, %10, %c0_i32_9 : i32
    scf.if %11 {
      %c0_10 = arith.constant 0 : index
      %c0_11 = arith.constant 0 : index
      %12 = vector.load %arg7[%c0_10, %c0_11] : memref<128x128xf32, #tpu.memory_space<vmem>>, vector<128x128xf32>
      %c0_12 = arith.constant 0 : index
      %c0_13 = arith.constant 0 : index
      %13 = vector.load %arg5[%c0_12, %c0_13] : memref<1x128xf32, #tpu.memory_space<vmem>>, vector<1x128xf32>
      %14 = vector.broadcast %13 : vector<1x128xf32> to vector<128x128xf32>
      %15 = arith.addf %12, %14 : vector<128x128xf32>
      %cst_14 = arith.constant 0.000000e+00 : f32
      %16 = vector.broadcast %cst_14 : f32 to vector<128x128xf32>
      %17 = arith.maximumf %15, %16 : vector<128x128xf32>
      %c0_15 = arith.constant 0 : index
      %c0_16 = arith.constant 0 : index
      %18 = vector.load %arg6[%c0_15, %c0_16] : memref<128x128xf32, #tpu.memory_space<vmem>>, vector<128x128xf32>
      tpu.vector_store %arg6[%c0_15, %c0_16], %17 {strides = array<i32>} : memref<128x128xf32, #tpu.memory_space<vmem>>, vector<128x128xf32>,
    } else {
    }
    return
  }
  func.func @transform_0(%arg0: i32, %arg1: i32, %arg2: i32) -> (i32, i32) {
    %c0_i32 = arith.constant 0 : i32
    return %arg0, %arg2 : i32, i32
  }
  func.func @transform_1(%arg0: i32, %arg1: i32, %arg2: i32) -> (i32, i32) {
    %c0_i32 = arith.constant 0 : i32
    return %arg2, %arg1 : i32, i32
  }
  func.func @transform_2(%arg0: i32, %arg1: i32, %arg2: i32) -> (i32, i32) {
    %c0_i32 = arith.constant 0 : i32
    %c0_i32_0 = arith.constant 0 : i32
    return %c0_i32, %arg1 : i32, i32
  }
  func.func @transform_3(%arg0: i32, %arg1: i32, %arg2: i32) -> (i32, i32) {
    %c0_i32 = arith.constant 0 : i32
    return %arg0, %arg1 : i32, i32
  }
}

module attributes {stable_mosaic.version = 11 : i64} {
  func.func @_mm_bias_kernel(%arg0: i32, %arg1: i32, %arg2: i32, %arg3: memref<128x384xbf16, #tpu.memory_space<vmem>>, %arg4: memref<384x128xbf16, #tpu.memory_space<vmem>>, %arg5: memref<1x128xf32, #tpu.memory_space<vmem>>, %arg6: memref<128x128xf32, #tpu.memory_space<vmem>>, %arg7: memref<128x128xf32, #tpu.memory_space<vmem>>) attributes {dimension_semantics = [#tpu.dimension_semantics<parallel>, #tpu.dimension_semantics<parallel>, #tpu.dimension_semantics<arbitrary>], iteration_bounds = array<i64: 1, 1, 1>, scalar_prefetch = 0 : i64, scratch_operands = 1 : i64, tpu.core_type = #tpu.core_type<tc>, window_params = [{transform_indices = @transform_0, window_bounds = array<i64: 128, 384>}, {transform_indices = @transform_1, window_bounds = array<i64: 384, 128>}, {transform_indices = @transform_2, window_bounds = array<i64: 1, 128>}, {transform_indices = @transform_3, window_bounds = array<i64: 128, 128>}]} {
    %c0_i32 = arith.constant 0 : i32
    %0 = arith.cmpi eq, %arg2, %c0_i32 : i32
    %1 = arith.extui %0 : i1 to i32
    %c0_i32_0 = arith.constant 0 : i32
    %2 = arith.cmpi ne, %1, %c0_i32_0 : i32
    scf.if %2 {
      %cst_10 = arith.constant 0.000000e+00 : f32
      %12 = vector.broadcast %cst_10 : f32 to vector<128x128xf32>
      %c0_11 = arith.constant 0 : index
      %c0_12 = arith.constant 0 : index
      %13 = vector.load %arg7[%c0_11, %c0_12] : memref<128x128xf32, #tpu.memory_space<vmem>>, vector<128x128xf32>
      tpu.vector_store %arg7[%c0_11, %c0_12], %12 {strides = array<i32>} : memref<128x128xf32, #tpu.memory_space<vmem>>, vector<128x128xf32>,
    } else {
    }
    %c0 = arith.constant 0 : index
    %c0_1 = arith.constant 0 : index
    %3 = vector.load %arg7[%c0, %c0_1] : memref<128x128xf32, #tpu.memory_space<vmem>>, vector<128x128xf32>
    %c0_2 = arith.constant 0 : index
    %c0_3 = arith.constant 0 : index
    %4 = vector.load %arg3[%c0_2, %c0_3] : memref<128x384xbf16, #tpu.memory_space<vmem>>, vector<128x384xbf16>
    %c0_4 = arith.constant 0 : index
    %c0_5 = arith.constant 0 : index
    %5 = vector.load %arg4[%c0_4, %c0_5] : memref<384x128xbf16, #tpu.memory_space<vmem>>, vector<384x128xbf16>
    %cst = arith.constant dense<0.000000e+00> : vector<128x128xf32>
    %6 = tpu.matmul %4, %5, %cst {dimension_numbers = #tpu.dot_dimension_numbers<[1], [0], [0], [1], [0, 0, 1, 1], [], []>} : vector<128x384xbf16>, vector<384x128xbf16>, vector<128x128xf32> -> vector<128x128xf32>
    %7 = arith.addf %3, %6 : vector<128x128xf32>
    %c0_6 = arith.constant 0 : index
    %c0_7 = arith.constant 0 : index
    %8 = vector.load %arg7[%c0_6, %c0_7] : memref<128x128xf32, #tpu.memory_space<vmem>>, vector<128x128xf32>
    tpu.vector_store %arg7[%c0_6, %c0_7], %7 {strides = array<i32>} : memref<128x128xf32, #tpu.memory_space<vmem>>, vector<128x128xf32>,
    %c0_i32_8 = arith.constant 0 : i32
    %9 = arith.cmpi eq, %arg2, %c0_i32_8 : i32
    %10 = arith.extui %9 : i1 to i32
    %c0_i32_9 = arith.constant 0 : i32
    %11 = arith.cmpi ne, %10, %c0_i32_9 : i32
    scf.if %11 {
      %c0_10 = arith.constant 0 : index
      %c0_11 = arith.constant 0 : index
      %12 = vector.load %arg7[%c0_10, %c0_11] : memref<128x128xf32, #tpu.memory_space<vmem>>, vector<128x128xf32>
      %c0_12 = arith.constant 0 : index
      %c0_13 = arith.constant 0 : index
      %13 = vector.load %arg5[%c0_12, %c0_13] : memref<1x128xf32, #tpu.memory_space<vmem>>, vector<1x128xf32>
      %14 = vector.broadcast %13 : vector<1x128xf32> to vector<128x128xf32>
      %15 = arith.addf %12, %14 : vector<128x128xf32>
      %cst_14 = arith.constant 0.000000e+00 : f32
      %16 = vector.broadcast %cst_14 : f32 to vector<128x128xf32>
      %17 = arith.maximumf %15, %16 : vector<128x128xf32>
      %c0_15 = arith.constant 0 : index
      %c0_16 = arith.constant 0 : index
      %18 = vector.load %arg6[%c0_15, %c0_16] : memref<128x128xf32, #tpu.memory_space<vmem>>, vector<128x128xf32>
      tpu.vector_store %arg6[%c0_15, %c0_16], %17 {strides = array<i32>} : memref<128x128xf32, #tpu.memory_space<vmem>>, vector<128x128xf32>,
    } else {
    }
    return
  }
  func.func @transform_0(%arg0: i32, %arg1: i32, %arg2: i32) -> (i32, i32) {
    %c0_i32 = arith.constant 0 : i32
    return %arg0, %arg2 : i32, i32
  }
  func.func @transform_1(%arg0: i32, %arg1: i32, %arg2: i32) -> (i32, i32) {
    %c0_i32 = arith.constant 0 : i32
    return %arg2, %arg1 : i32, i32
  }
  func.func @transform_2(%arg0: i32, %arg1: i32, %arg2: i32) -> (i32, i32) {
    %c0_i32 = arith.constant 0 : i32
    %c0_i32_0 = arith.constant 0 : i32
    return %c0_i32, %arg1 : i32, i32
  }
  func.func @transform_3(%arg0: i32, %arg1: i32, %arg2: i32) -> (i32, i32) {
    %c0_i32 = arith.constant 0 : i32
    return %arg0, %arg1 : i32, i32
  }
}

module attributes {stable_mosaic.version = 11 : i64} {
  func.func @_mm_bias_kernel(%arg0: i32, %arg1: i32, %arg2: i32, %arg3: memref<128x128xbf16, #tpu.memory_space<vmem>>, %arg4: memref<128x128xbf16, #tpu.memory_space<vmem>>, %arg5: memref<1x128xf32, #tpu.memory_space<vmem>>, %arg6: memref<128x128xf32, #tpu.memory_space<vmem>>, %arg7: memref<128x128xf32, #tpu.memory_space<vmem>>) attributes {dimension_semantics = [#tpu.dimension_semantics<parallel>, #tpu.dimension_semantics<parallel>, #tpu.dimension_semantics<arbitrary>], iteration_bounds = array<i64: 1, 1, 1>, scalar_prefetch = 0 : i64, scratch_operands = 1 : i64, tpu.core_type = #tpu.core_type<tc>, window_params = [{transform_indices = @transform_0, window_bounds = array<i64: 128, 128>}, {transform_indices = @transform_1, window_bounds = array<i64: 128, 128>}, {transform_indices = @transform_2, window_bounds = array<i64: 1, 128>}, {transform_indices = @transform_3, window_bounds = array<i64: 128, 128>}]} {
    %c0_i32 = arith.constant 0 : i32
    %0 = arith.cmpi eq, %arg2, %c0_i32 : i32
    %1 = arith.extui %0 : i1 to i32
    %c0_i32_0 = arith.constant 0 : i32
    %2 = arith.cmpi ne, %1, %c0_i32_0 : i32
    scf.if %2 {
      %cst_10 = arith.constant 0.000000e+00 : f32
      %12 = vector.broadcast %cst_10 : f32 to vector<128x128xf32>
      %c0_11 = arith.constant 0 : index
      %c0_12 = arith.constant 0 : index
      %13 = vector.load %arg7[%c0_11, %c0_12] : memref<128x128xf32, #tpu.memory_space<vmem>>, vector<128x128xf32>
      tpu.vector_store %arg7[%c0_11, %c0_12], %12 {strides = array<i32>} : memref<128x128xf32, #tpu.memory_space<vmem>>, vector<128x128xf32>,
    } else {
    }
    %c0 = arith.constant 0 : index
    %c0_1 = arith.constant 0 : index
    %3 = vector.load %arg7[%c0, %c0_1] : memref<128x128xf32, #tpu.memory_space<vmem>>, vector<128x128xf32>
    %c0_2 = arith.constant 0 : index
    %c0_3 = arith.constant 0 : index
    %4 = vector.load %arg3[%c0_2, %c0_3] : memref<128x128xbf16, #tpu.memory_space<vmem>>, vector<128x128xbf16>
    %c0_4 = arith.constant 0 : index
    %c0_5 = arith.constant 0 : index
    %5 = vector.load %arg4[%c0_4, %c0_5] : memref<128x128xbf16, #tpu.memory_space<vmem>>, vector<128x128xbf16>
    %cst = arith.constant dense<0.000000e+00> : vector<128x128xf32>
    %6 = tpu.matmul %4, %5, %cst {dimension_numbers = #tpu.dot_dimension_numbers<[1], [0], [0], [1], [0, 0, 1, 1], [], []>} : vector<128x128xbf16>, vector<128x128xbf16>, vector<128x128xf32> -> vector<128x128xf32>
    %7 = arith.addf %3, %6 : vector<128x128xf32>
    %c0_6 = arith.constant 0 : index
    %c0_7 = arith.constant 0 : index
    %8 = vector.load %arg7[%c0_6, %c0_7] : memref<128x128xf32, #tpu.memory_space<vmem>>, vector<128x128xf32>
    tpu.vector_store %arg7[%c0_6, %c0_7], %7 {strides = array<i32>} : memref<128x128xf32, #tpu.memory_space<vmem>>, vector<128x128xf32>,
    %c0_i32_8 = arith.constant 0 : i32
    %9 = arith.cmpi eq, %arg2, %c0_i32_8 : i32
    %10 = arith.extui %9 : i1 to i32
    %c0_i32_9 = arith.constant 0 : i32
    %11 = arith.cmpi ne, %10, %c0_i32_9 : i32
    scf.if %11 {
      %c0_10 = arith.constant 0 : index
      %c0_11 = arith.constant 0 : index
      %12 = vector.load %arg7[%c0_10, %c0_11] : memref<128x128xf32, #tpu.memory_space<vmem>>, vector<128x128xf32>
      %c0_12 = arith.constant 0 : index
      %c0_13 = arith.constant 0 : index
      %13 = vector.load %arg5[%c0_12, %c0_13] : memref<1x128xf32, #tpu.memory_space<vmem>>, vector<1x128xf32>
      %14 = vector.broadcast %13 : vector<1x128xf32> to vector<128x128xf32>
      %15 = arith.addf %12, %14 : vector<128x128xf32>
      %c0_14 = arith.constant 0 : index
      %c0_15 = arith.constant 0 : index
      %16 = vector.load %arg6[%c0_14, %c0_15] : memref<128x128xf32, #tpu.memory_space<vmem>>, vector<128x128xf32>
      tpu.vector_store %arg6[%c0_14, %c0_15], %15 {strides = array<i32>} : memref<128x128xf32, #tpu.memory_space<vmem>>, vector<128x128xf32>,
    } else {
    }
    return
  }
  func.func @transform_0(%arg0: i32, %arg1: i32, %arg2: i32) -> (i32, i32) {
    %c0_i32 = arith.constant 0 : i32
    return %arg0, %arg2 : i32, i32
  }
  func.func @transform_1(%arg0: i32, %arg1: i32, %arg2: i32) -> (i32, i32) {
    %c0_i32 = arith.constant 0 : i32
    return %arg2, %arg1 : i32, i32
  }
  func.func @transform_2(%arg0: i32, %arg1: i32, %arg2: i32) -> (i32, i32) {
    %c0_i32 = arith.constant 0 : i32
    %c0_i32_0 = arith.constant 0 : i32
    return %c0_i32, %arg1 : i32, i32
  }
  func.func @transform_3(%arg0: i32, %arg1: i32, %arg2: i32) -> (i32, i32) {
    %c0_i32 = arith.constant 0 : i32
    return %arg0, %arg1 : i32, i32
  }
}

module attributes {stable_mosaic.version = 11 : i64} {
  func.func @_rcnn_head_kernel(%arg0: i32, %arg1: memref<16x512xbf16, #tpu.memory_space<vmem>>, %arg2: memref<512x128xbf16, #tpu.memory_space<vmem>>, %arg3: memref<1x128xf32, #tpu.memory_space<vmem>>, %arg4: memref<128x128xbf16, #tpu.memory_space<vmem>>, %arg5: memref<1x128xf32, #tpu.memory_space<vmem>>, %arg6: memref<128x128xbf16, #tpu.memory_space<vmem>>, %arg7: memref<1x128xf32, #tpu.memory_space<vmem>>, %arg8: memref<16x128xf32, #tpu.memory_space<vmem>>) attributes {dimension_semantics = [#tpu.dimension_semantics<parallel>], iteration_bounds = array<i64: 1>, scalar_prefetch = 0 : i64, scratch_operands = 0 : i64, tpu.core_type = #tpu.core_type<tc>, window_params = [{transform_indices = @transform_0, window_bounds = array<i64: 16, 512>}, {pipeline_mode = #tpu.pipeline_mode<synchronous>, transform_indices = @transform_1, window_bounds = array<i64: 512, 128>}, {pipeline_mode = #tpu.pipeline_mode<synchronous>, transform_indices = @transform_2, window_bounds = array<i64: 1, 128>}, {pipeline_mode = #tpu.pipeline_mode<synchronous>, transform_indices = @transform_3, window_bounds = array<i64: 128, 128>}, {pipeline_mode = #tpu.pipeline_mode<synchronous>, transform_indices = @transform_4, window_bounds = array<i64: 1, 128>}, {pipeline_mode = #tpu.pipeline_mode<synchronous>, transform_indices = @transform_5, window_bounds = array<i64: 128, 128>}, {pipeline_mode = #tpu.pipeline_mode<synchronous>, transform_indices = @transform_6, window_bounds = array<i64: 1, 128>}, {transform_indices = @transform_7, window_bounds = array<i64: 16, 128>}]} {
    %c0 = arith.constant 0 : index
    %c0_0 = arith.constant 0 : index
    %0 = vector.load %arg1[%c0, %c0_0] : memref<16x512xbf16, #tpu.memory_space<vmem>>, vector<16x512xbf16>
    %c0_1 = arith.constant 0 : index
    %c0_2 = arith.constant 0 : index
    %1 = vector.load %arg2[%c0_1, %c0_2] : memref<512x128xbf16, #tpu.memory_space<vmem>>, vector<512x128xbf16>
    %cst = arith.constant dense<0.000000e+00> : vector<16x128xf32>
    %2 = tpu.matmul %0, %1, %cst {dimension_numbers = #tpu.dot_dimension_numbers<[1], [0], [0], [1], [0, 0, 1, 1], [], []>} : vector<16x512xbf16>, vector<512x128xbf16>, vector<16x128xf32> -> vector<16x128xf32>
    %c0_3 = arith.constant 0 : index
    %c0_4 = arith.constant 0 : index
    %3 = vector.load %arg3[%c0_3, %c0_4] : memref<1x128xf32, #tpu.memory_space<vmem>>, vector<1x128xf32>
    %4 = vector.broadcast %3 : vector<1x128xf32> to vector<16x128xf32>
    %5 = arith.addf %2, %4 : vector<16x128xf32>
    %cst_5 = arith.constant 0.000000e+00 : f32
    %6 = vector.broadcast %cst_5 : f32 to vector<16x128xf32>
    %7 = arith.maximumf %5, %6 : vector<16x128xf32>
    %8 = arith.truncf %7 : vector<16x128xf32> to vector<16x128xbf16>
    %c0_6 = arith.constant 0 : index
    %c0_7 = arith.constant 0 : index
    %9 = vector.load %arg4[%c0_6, %c0_7] : memref<128x128xbf16, #tpu.memory_space<vmem>>, vector<128x128xbf16>
    %cst_8 = arith.constant dense<0.000000e+00> : vector<16x128xf32>
    %10 = tpu.matmul %8, %9, %cst_8 {dimension_numbers = #tpu.dot_dimension_numbers<[1], [0], [0], [1], [0, 0, 1, 1], [], []>} : vector<16x128xbf16>, vector<128x128xbf16>, vector<16x128xf32> -> vector<16x128xf32>
    %c0_9 = arith.constant 0 : index
    %c0_10 = arith.constant 0 : index
    %11 = vector.load %arg5[%c0_9, %c0_10] : memref<1x128xf32, #tpu.memory_space<vmem>>, vector<1x128xf32>
    %12 = vector.broadcast %11 : vector<1x128xf32> to vector<16x128xf32>
    %13 = arith.addf %10, %12 : vector<16x128xf32>
    %cst_11 = arith.constant 0.000000e+00 : f32
    %14 = vector.broadcast %cst_11 : f32 to vector<16x128xf32>
    %15 = arith.maximumf %13, %14 : vector<16x128xf32>
    %16 = arith.truncf %15 : vector<16x128xf32> to vector<16x128xbf16>
    %c0_12 = arith.constant 0 : index
    %c0_13 = arith.constant 0 : index
    %17 = vector.load %arg6[%c0_12, %c0_13] : memref<128x128xbf16, #tpu.memory_space<vmem>>, vector<128x128xbf16>
    %cst_14 = arith.constant dense<0.000000e+00> : vector<16x128xf32>
    %18 = tpu.matmul %16, %17, %cst_14 {dimension_numbers = #tpu.dot_dimension_numbers<[1], [0], [0], [1], [0, 0, 1, 1], [], []>} : vector<16x128xbf16>, vector<128x128xbf16>, vector<16x128xf32> -> vector<16x128xf32>
    %c0_15 = arith.constant 0 : index
    %c0_16 = arith.constant 0 : index
    %19 = vector.load %arg7[%c0_15, %c0_16] : memref<1x128xf32, #tpu.memory_space<vmem>>, vector<1x128xf32>
    %20 = vector.broadcast %19 : vector<1x128xf32> to vector<16x128xf32>
    %21 = arith.addf %18, %20 : vector<16x128xf32>
    %c0_17 = arith.constant 0 : index
    %c0_18 = arith.constant 0 : index
    %22 = vector.load %arg8[%c0_17, %c0_18] : memref<16x128xf32, #tpu.memory_space<vmem>>, vector<16x128xf32>
    tpu.vector_store %arg8[%c0_17, %c0_18], %21 {strides = array<i32>} : memref<16x128xf32, #tpu.memory_space<vmem>>, vector<16x128xf32>,
    return
  }
  func.func @transform_0(%arg0: i32) -> (i32, i32) {
    %c0_i32 = arith.constant 0 : i32
    %c0_i32_0 = arith.constant 0 : i32
    return %arg0, %c0_i32 : i32, i32
  }
  func.func @transform_1(%arg0: i32) -> (i32, i32) {
    %c0_i32 = arith.constant 0 : i32
    %c0_i32_0 = arith.constant 0 : i32
    %c0_i32_1 = arith.constant 0 : i32
    return %c0_i32, %c0_i32_0 : i32, i32
  }
  func.func @transform_2(%arg0: i32) -> (i32, i32) {
    %c0_i32 = arith.constant 0 : i32
    %c0_i32_0 = arith.constant 0 : i32
    %c0_i32_1 = arith.constant 0 : i32
    return %c0_i32, %c0_i32_0 : i32, i32
  }
  func.func @transform_3(%arg0: i32) -> (i32, i32) {
    %c0_i32 = arith.constant 0 : i32
    %c0_i32_0 = arith.constant 0 : i32
    %c0_i32_1 = arith.constant 0 : i32
    return %c0_i32, %c0_i32_0 : i32, i32
  }
  func.func @transform_4(%arg0: i32) -> (i32, i32) {
    %c0_i32 = arith.constant 0 : i32
    %c0_i32_0 = arith.constant 0 : i32
    %c0_i32_1 = arith.constant 0 : i32
    return %c0_i32, %c0_i32_0 : i32, i32
  }
  func.func @transform_5(%arg0: i32) -> (i32, i32) {
    %c0_i32 = arith.constant 0 : i32
    %c0_i32_0 = arith.constant 0 : i32
    %c0_i32_1 = arith.constant 0 : i32
    return %c0_i32, %c0_i32_0 : i32, i32
  }
  func.func @transform_6(%arg0: i32) -> (i32, i32) {
    %c0_i32 = arith.constant 0 : i32
    %c0_i32_0 = arith.constant 0 : i32
    %c0_i32_1 = arith.constant 0 : i32
    return %c0_i32, %c0_i32_0 : i32, i32
  }
  func.func @transform_7(%arg0: i32) -> (i32, i32) {
    %c0_i32 = arith.constant 0 : i32
    %c0_i32_0 = arith.constant 0 : i32
    return %arg0, %c0_i32 : i32, i32
  }
}

</mosaic_0001>

<bundles_post_ra>
// kernel: faster_rcnn_forward.5
= control target key start
LH: loop header
LB: loop body
LE: loop exit
PB: predicated region body
PF: predicated region fallthrough
CT: control target
= control target key end

     0   :  { %s1772_s1 = inlined_call_operand.vmem [shape: bf16[128,128], index: 1, kind: input, shape index: {}]   ;;  %s1773_s0 = inlined_call_operand.vmem [shape: bf16[512,128], index: 0, kind: input, shape index: {}]   ;;  %s1774_s2 = inlined_call_operand.vmem [shape: f32[1,128], index: 2, kind: input, shape index: {}]   ;;  %s1775_s3 = inlined_call_operand.vmem [shape: f32[512,128], index: 3, kind: output, shape index: {}]  }
   0x1   :  { %v1331_v0 = vld [vmem:[%s1772_s1 + $0x38] sm:$0xff]   ;;  %v1332_v1 = vld [vmem:[%s1772_s1 + $0x30] sm:$0xff]   ;;  %v1333_v2 = vld [vmem:[%s1772_s1 + $0x28] sm:$0xff]  }
   0x2   :  { %1235 = vmatprep.subr.bf16.mxu0 %v1331_v0  ;;  %1315 = vmatprep.subr.bf16.mxu1 %v1331_v0  ;;  %v1334_v3 = vld [vmem:[%s1772_s1 + $0x20] sm:$0xff]   ;;  %v1335_v6 = vld [vmem:[%s1772_s1 + $0x18] sm:$0xff]   ;;  %v1336_v7 = vld [vmem:[%s1772_s1 + $0x10] sm:$0xff]  }
   0x3   :  { %1236 = vmatpush3.bf16.msra.mxu0 %v1331_v0  ;;  %1323 = vmatpush3.bf16.msra.mxu1 %v1331_v0  ;;  %v1339_v4 = vld [vmem:[%s1773_s0] sm:$0xff]   ;;  %v1337_v8 = vld [vmem:[%s1772_s1 + $0x8] sm:$0xff]   ;;  %v1343_v12 = vld [vmem:[%s1773_s0 + $0x10] sm:$0xff]  }
   0x4   :  { %1237 = vmatprep.subr.bf16.mxu0 %v1332_v1  ;;  %1316 = vmatprep.subr.bf16.mxu1 %v1332_v1  ;;  %v1340_v5 = vld [vmem:[%s1773_s0 + $0x80] sm:$0xff]   ;;  %v1341_v10 = vld [vmem:[%s1773_s0 + $0x8] sm:$0xff]   ;;  %v1344_v13 = vld [vmem:[%s1773_s0 + $0x90] sm:$0xff]  }
   0x5   :  { %1251 = vmatprep.mubr.bf16.mxu0 %v1339_v4  ;;  %1283 = vmatprep.mubr.bf16.mxu1 %v1340_v5  ;;  %v1338_v9 = vld [vmem:[%s1772_s1] sm:$0xff]   ;;  %v1342_v11 = vld [vmem:[%s1773_s0 + $0x88] sm:$0xff]   ;;  %v1345_v14 = vld [vmem:[%s1773_s0 + $0x18] sm:$0xff]  }
   0x6   :  { %v1346_v15 = vld [vmem:[%s1773_s0 + $0x98] sm:$0xff]   ;;  %v1347_v16 = vld [vmem:[%s1773_s0 + $0x20] sm:$0xff]   ;;  %v1349_v18 = vld [vmem:[%s1773_s0 + $0x28] sm:$0xff]  }
   0x7   :  { %1238 = vmatpush3.bf16.msra.mxu0 %v1332_v1  ;;  %1324 = vmatpush3.bf16.msra.mxu1 %v1332_v1  ;;  %v1348_v17 = vld [vmem:[%s1773_s0 + $0xa0] sm:$0xff]   ;;  %v1350_v19 = vld [vmem:[%s1773_s0 + $0xa8] sm:$0xff]   ;;  %v1351_v20 = vld [vmem:[%s1773_s0 + $0x30] sm:$0xff]  }
   0x8   :  { %1239 = vmatprep.subr.bf16.mxu0 %v1333_v2  ;;  %1317 = vmatprep.subr.bf16.mxu1 %v1333_v2  ;;  %v1352_v21 = vld [vmem:[%s1773_s0 + $0xb0] sm:$0xff]   ;;  %v1353_v22 = vld [vmem:[%s1773_s0 + $0x38] sm:$0xff]   ;;  %v1355_v24 = vld [vmem:[%s1773_s0 + $0x40] sm:$0xff]  }
   0x9   :  { %v1354_v23 = vld [vmem:[%s1773_s0 + $0xb8] sm:$0xff]   ;;  %v1356_v25 = vld [vmem:[%s1773_s0 + $0xc0] sm:$0xff]   ;;  %v1357_v26 = vld [vmem:[%s1773_s0 + $0x48] sm:$0xff]  }
   0xa   :  { %v1358_v27 = vld [vmem:[%s1773_s0 + $0xc8] sm:$0xff]   ;;  %v1359_v28 = vld [vmem:[%s1773_s0 + $0x50] sm:$0xff]   ;;  %v1361_v30 = vld [vmem:[%s1773_s0 + $0x58] sm:$0xff]  }
   0xb   :  { %1240 = vmatpush3.bf16.msra.mxu0 %v1333_v2  ;;  %1325 = vmatpush3.bf16.msra.mxu1 %v1333_v2  ;;  %v1360_v29 = vld [vmem:[%s1773_s0 + $0xd0] sm:$0xff]   ;;  %v1362_v31 = vld [vmem:[%s1773_s0 + $0xd8] sm:$0xff]   ;;  %v1363_v32 = vld [vmem:[%s1773_s0 + $0x60] sm:$0xff]  }
   0xc   :  { %1241 = vmatprep.subr.bf16.mxu0 %v1334_v3  ;;  %1318 = vmatprep.subr.bf16.mxu1 %v1334_v3  ;;  %v1364_v33 = vld [vmem:[%s1773_s0 + $0xe0] sm:$0xff]   ;;  %v1365_v34 = vld [vmem:[%s1773_s0 + $0x68] sm:$0xff]   ;;  %v1367_v36 = vld [vmem:[%s1773_s0 + $0x70] sm:$0xff]  }
   0xd   :  { %v1366_v35 = vld [vmem:[%s1773_s0 + $0xe8] sm:$0xff]   ;;  %v1368_v37 = vld [vmem:[%s1773_s0 + $0xf0] sm:$0xff]   ;;  %v1369_v38 = vld [vmem:[%s1773_s0 + $0x78] sm:$0xff]  }
   0xe   :  { %v1370_v39 = vld [vmem:[%s1773_s0 + $0xf8] sm:$0xff]   ;;  %v1514_v40 = vld [vmem:[%s1774_s2] ss:$0 sm:$0xff] }
   0xf   :  { %1242 = vmatpush3.bf16.msra.mxu0 %v1334_v3  ;;  %1326 = vmatpush3.bf16.msra.mxu1 %v1334_v3 }
  0x10   :  { %1243 = vmatprep.subr.bf16.mxu0 %v1335_v6  ;;  %1319 = vmatprep.subr.bf16.mxu1 %v1335_v6 }
  0x13   :  { %1244 = vmatpush3.bf16.msra.mxu0 %v1335_v6  ;;  %1327 = vmatpush3.bf16.msra.mxu1 %v1335_v6 }
  0x14   :  { %1245 = vmatprep.subr.bf16.mxu0 %v1336_v7  ;;  %1320 = vmatprep.subr.bf16.mxu1 %v1336_v7 }
  0x17   :  { %1246 = vmatpush3.bf16.msra.mxu0 %v1336_v7  ;;  %1328 = vmatpush3.bf16.msra.mxu1 %v1336_v7 }
  0x18   :  { %1247 = vmatprep.subr.bf16.mxu0 %v1337_v8  ;;  %1321 = vmatprep.subr.bf16.mxu1 %v1337_v8 }
  0x1b   :  { %1248 = vmatpush3.bf16.msra.mxu0 %v1337_v8  ;;  %1329 = vmatpush3.bf16.msra.mxu1 %v1337_v8 }
  0x1c   :  { %1249 = vmatprep.subr.bf16.mxu0 %v1338_v9  ;;  %1322 = vmatprep.subr.bf16.mxu1 %v1338_v9 }
  0x1f   :  { %1250 = vmatpush3.bf16.msra.mxu0 %v1338_v9  ;;  %1330 = vmatpush3.bf16.msra.mxu1 %v1338_v9 }
  0x22   :  { %1252 = vmatmul.mubr.bf16.vlgmr.msra.gmra.mxu0 %v1341_v10  ;;  %1284 = vmatmul.mubr.bf16.vlgmr.msra.gmra.mxu1 %v1342_v11 }
  0x23   :  { %1255 = vmatprep.mubr.bf16.mxu0 %v1343_v12  ;;  %1287 = vmatprep.mubr.bf16.mxu1 %v1344_v13 }
  0x2a   :  { %1256 = vmatmul.mubr.bf16.gmra.mxu0 %v1345_v14  ;;  %1288 = vmatmul.mubr.bf16.gmra.mxu1 %v1346_v15 }
  0x2b   :  { %1259 = vmatprep.mubr.bf16.mxu0 %v1347_v16  ;;  %1291 = vmatprep.mubr.bf16.mxu1 %v1348_v17 }
  0x32   :  { %1260 = vmatmul.mubr.bf16.gmra.mxu0 %v1349_v18  ;;  %1292 = vmatmul.mubr.bf16.gmra.mxu1 %v1350_v19 }
  0x33   :  { %1263 = vmatprep.mubr.bf16.mxu0 %v1351_v20  ;;  %1295 = vmatprep.mubr.bf16.mxu1 %v1352_v21 }
  0x3a   :  { %1264 = vmatmul.mubr.bf16.gmra.mxu0 %v1353_v22  ;;  %1296 = vmatmul.mubr.bf16.gmra.mxu1 %v1354_v23 }
  0x3b   :  { %1267 = vmatprep.mubr.bf16.mxu0 %v1355_v24  ;;  %1299 = vmatprep.mubr.bf16.mxu1 %v1356_v25 }
  0x42   :  { %1268 = vmatmul.mubr.bf16.gmra.mxu0 %v1357_v26  ;;  %1300 = vmatmul.mubr.bf16.gmra.mxu1 %v1358_v27 }
  0x43   :  { %1271 = vmatprep.mubr.bf16.mxu0 %v1359_v28  ;;  %1303 = vmatprep.mubr.bf16.mxu1 %v1360_v29 }
  0x4a   :  { %1272 = vmatmul.mubr.bf16.gmra.mxu0 %v1361_v30  ;;  %1304 = vmatmul.mubr.bf16.gmra.mxu1 %v1362_v31 }
  0x4b   :  { %1275 = vmatprep.mubr.bf16.mxu0 %v1363_v32  ;;  %1307 = vmatprep.mubr.bf16.mxu1 %v1364_v33 }
  0x52   :  { %1276 = vmatmul.mubr.bf16.gmra.mxu0 %v1365_v34  ;;  %1308 = vmatmul.mubr.bf16.gmra.mxu1 %v1366_v35 }
  0x53   :  { %1279 = vmatprep.mubr.bf16.mxu0 %v1367_v36  ;;  %1311 = vmatprep.mubr.bf16.mxu1 %v1368_v37 }
  0x5a   :  { %1280 = vmatmul.mubr.bf16.gmra.mxu0 %v1369_v38  ;;  %1312 = vmatmul.mubr.bf16.gmra.mxu1 %v1370_v39 }
  0xe2   :  { %v1253_v41 = vpop.f32.mrf.mxu0  ;;  %v1285_v42 = vpop.f32.mrf.mxu1 }
  0xe3   :  { %v960_v43 = vadd.f32 %v1253_v41, %v1514_v40  ;;  %v992_v44 = vadd.f32 %v1285_v42, %v1514_v40 }
  0xe4   :  { %v501_v45 = vpop.f32.mrf.mxu0  ;;  %v629_v46 = vpop.f32.mrf.mxu1 }
  0xe5   :  { %v1024_v47 = vmax.f32 %v960_v43, 0.0  ;;  %v1056_v48 = vmax.f32 %v992_v44, 0.0  ;;  %v958_v49 = vadd.f32 %v1514_v40, %v501_v45  ;;  %v990_v50 = vadd.f32 %v1514_v40, %v629_v46 }
  0xe6   :  { %v1254_v51 = vpop.f32.mrf.mxu0  ;;  %v1286_v52 = vpop.f32.mrf.mxu1 }
  0xe7   :  { %1088 = vst [vmem:[%s1775_s3 + $0x10] sm:$0xff] %v1024_v47  ;;  %1120 = vst [vmem:[%s1775_s3 + $0x110] sm:$0xff] %v1056_v48  ;;  %v1022_v53 = vmax.f32 %v958_v49, 0.0  ;;  %v1054_v54 = vmax.f32 %v990_v50, 0.0  ;;  %v961_v55 = vadd.f32 %v1254_v51, %v1514_v40  ;;  %v993_v56 = vadd.f32 %v1286_v52, %v1514_v40 }
  0xe8   :  { %v504_v57 = vpop.f32.mrf.mxu0  ;;  %v632_v58 = vpop.f32.mrf.mxu1 }
  0xe9   :  { %1086 = vst [vmem:[%s1775_s3] sm:$0xff] %v1022_v53  ;;  %1118 = vst [vmem:[%s1775_s3 + $0x100] sm:$0xff] %v1054_v54  ;;  %v1025_v59 = vmax.f32 %v961_v55, 0.0  ;;  %v1057_v60 = vmax.f32 %v993_v56, 0.0  ;;  %v959_v61 = vadd.f32 %v1514_v40, %v504_v57  ;;  %v991_v62 = vadd.f32 %v1514_v40, %v632_v58 }
  0xea   :  { %v1257_v63 = vpop.f32.mrf.mxu0  ;;  %v1289_v0 = vpop.f32.mrf.mxu1 }
  0xeb   :  { %1089 = vst [vmem:[%s1775_s3 + $0x18] sm:$0xff] %v1025_v59  ;;  %1121 = vst [vmem:[%s1775_s3 + $0x118] sm:$0xff] %v1057_v60  ;;  %v1023_v1 = vmax.f32 %v959_v61, 0.0  ;;  %v1055_v2 = vmax.f32 %v991_v62, 0.0  ;;  %v964_v3 = vadd.f32 %v1257_v63, %v1514_v40  ;;  %v996_v4 = vadd.f32 %v1289_v0, %v1514_v40 }
  0xec   :  { %v517_v5 = vpop.f32.mrf.mxu0  ;;  %v645_v6 = vpop.f32.mrf.mxu1 }
  0xed   :  { %1087 = vst [vmem:[%s1775_s3 + $0x8] sm:$0xff] %v1023_v1  ;;  %1119 = vst [vmem:[%s1775_s3 + $0x108] sm:$0xff] %v1055_v2  ;;  %v1028_v7 = vmax.f32 %v964_v3, 0.0  ;;  %v1060_v8 = vmax.f32 %v996_v4, 0.0  ;;  %v962_v9 = vadd.f32 %v1514_v40, %v517_v5  ;;  %v994_v10 = vadd.f32 %v1514_v40, %v645_v6 }
  0xee   :  { %v1258_v11 = vpop.f32.mrf.mxu0  ;;  %v1290_v12 = vpop.f32.mrf.mxu1 }
  0xef   :  { %1092 = vst [vmem:[%s1775_s3 + $0x30] sm:$0xff] %v1028_v7  ;;  %1124 = vst [vmem:[%s1775_s3 + $0x130] sm:$0xff] %v1060_v8  ;;  %v1026_v13 = vmax.f32 %v962_v9, 0.0  ;;  %v1058_v14 = vmax.f32 %v994_v10, 0.0  ;;  %v965_v15 = vadd.f32 %v1258_v11, %v1514_v40  ;;  %v997_v16 = vadd.f32 %v1290_v12, %v1514_v40 }
  0xf0   :  { %v520_v17 = vpop.f32.mrf.mxu0  ;;  %v648_v18 = vpop.f32.mrf.mxu1 }
  0xf1   :  { %1090 = vst [vmem:[%s1775_s3 + $0x20] sm:$0xff] %v1026_v13  ;;  %1122 = vst [vmem:[%s1775_s3 + $0x120] sm:$0xff] %v1058_v14  ;;  %v1029_v19 = vmax.f32 %v965_v15, 0.0  ;;  %v1061_v20 = vmax.f32 %v997_v16, 0.0  ;;  %v963_v21 = vadd.f32 %v1514_v40, %v520_v17  ;;  %v995_v22 = vadd.f32 %v1514_v40, %v648_v18 }
  0xf2   :  { %v1261_v23 = vpop.f32.mrf.mxu0  ;;  %v1293_v24 = vpop.f32.mrf.mxu1 }
  0xf3   :  { %1093 = vst [vmem:[%s1775_s3 + $0x38] sm:$0xff] %v1029_v19  ;;  %1125 = vst [vmem:[%s1775_s3 + $0x138] sm:$0xff] %v1061_v20  ;;  %v1027_v25 = vmax.f32 %v963_v21, 0.0  ;;  %v1059_v26 = vmax.f32 %v995_v22, 0.0  ;;  %v968_v27 = vadd.f32 %v1261_v23, %v1514_v40  ;;  %v1000_v28 = vadd.f32 %v1293_v24, %v1514_v40 }
  0xf4   :  { %v533_v29 = vpop.f32.mrf.mxu0  ;;  %v661_v30 = vpop.f32.mrf.mxu1 }
  0xf5   :  { %1091 = vst [vmem:[%s1775_s3 + $0x28] sm:$0xff] %v1027_v25  ;;  %1123 = vst [vmem:[%s1775_s3 + $0x128] sm:$0xff] %v1059_v26  ;;  %v1032_v31 = vmax.f32 %v968_v27, 0.0  ;;  %v1064_v32 = vmax.f32 %v1000_v28, 0.0  ;;  %v966_v33 = vadd.f32 %v1514_v40, %v533_v29  ;;  %v998_v34 = vadd.f32 %v1514_v40, %v661_v30 }
  0xf6   :  { %v1262_v35 = vpop.f32.mrf.mxu0  ;;  %v1294_v36 = vpop.f32.mrf.mxu1 }
  0xf7   :  { %1096 = vst [vmem:[%s1775_s3 + $0x50] sm:$0xff] %v1032_v31  ;;  %1128 = vst [vmem:[%s1775_s3 + $0x150] sm:$0xff] %v1064_v32  ;;  %v1030_v37 = vmax.f32 %v966_v33, 0.0  ;;  %v1062_v38 = vmax.f32 %v998_v34, 0.0  ;;  %v969_v39 = vadd.f32 %v1262_v35, %v1514_v40  ;;  %v1001_v41 = vadd.f32 %v1294_v36, %v1514_v40 }
  0xf8   :  { %v536_v42 = vpop.f32.mrf.mxu0  ;;  %v664_v43 = vpop.f32.mrf.mxu1 }
  0xf9   :  { %1094 = vst [vmem:[%s1775_s3 + $0x40] sm:$0xff] %v1030_v37  ;;  %1126 = vst [vmem:[%s1775_s3 + $0x140] sm:$0xff] %v1062_v38  ;;  %v1033_v44 = vmax.f32 %v969_v39, 0.0  ;;  %v1065_v45 = vmax.f32 %v1001_v41, 0.0  ;;  %v967_v46 = vadd.f32 %v1514_v40, %v536_v42  ;;  %v999_v47 = vadd.f32 %v1514_v40, %v664_v43 }
  0xfa   :  { %v1265_v48 = vpop.f32.mrf.mxu0  ;;  %v1297_v49 = vpop.f32.mrf.mxu1 }
  0xfb   :  { %1097 = vst [vmem:[%s1775_s3 + $0x58] sm:$0xff] %v1033_v44  ;;  %1129 = vst [vmem:[%s1775_s3 + $0x158] sm:$0xff] %v1065_v45  ;;  %v1031_v50 = vmax.f32 %v967_v46, 0.0  ;;  %v1063_v51 = vmax.f32 %v999_v47, 0.0  ;;  %v972_v52 = vadd.f32 %v1265_v48, %v1514_v40  ;;  %v1004_v53 = vadd.f32 %v1297_v49, %v1514_v40 }
  0xfc   :  { %v549_v54 = vpop.f32.mrf.mxu0  ;;  %v677_v55 = vpop.f32.mrf.mxu1 }
  0xfd   :  { %1095 = vst [vmem:[%s1775_s3 + $0x48] sm:$0xff] %v1031_v50  ;;  %1127 = vst [vmem:[%s1775_s3 + $0x148] sm:$0xff] %v1063_v51  ;;  %v1036_v56 = vmax.f32 %v972_v52, 0.0  ;;  %v1068_v57 = vmax.f32 %v1004_v53, 0.0  ;;  %v970_v58 = vadd.f32 %v1514_v40, %v549_v54  ;;  %v1002_v59 = vadd.f32 %v1514_v40, %v677_v55 }
  0xfe   :  { %v1266_v60 = vpop.f32.mrf.mxu0  ;;  %v1298_v61 = vpop.f32.mrf.mxu1 }
  0xff   :  { %1100 = vst [vmem:[%s1775_s3 + $0x70] sm:$0xff] %v1036_v56  ;;  %1132 = vst [vmem:[%s1775_s3 + $0x170] sm:$0xff] %v1068_v57  ;;  %v1034_v62 = vmax.f32 %v970_v58, 0.0  ;;  %v1066_v63 = vmax.f32 %v1002_v59, 0.0  ;;  %v973_v0 = vadd.f32 %v1266_v60, %v1514_v40  ;;  %v1005_v1 = vadd.f32 %v1298_v61, %v1514_v40 }
 0x100   :  { %v552_v2 = vpop.f32.mrf.mxu0  ;;  %v680_v3 = vpop.f32.mrf.mxu1 }
 0x101   :  { %1098 = vst [vmem:[%s1775_s3 + $0x60] sm:$0xff] %v1034_v62  ;;  %1130 = vst [vmem:[%s1775_s3 + $0x160] sm:$0xff] %v1066_v63  ;;  %v1037_v4 = vmax.f32 %v973_v0, 0.0  ;;  %v1069_v5 = vmax.f32 %v1005_v1, 0.0  ;;  %v971_v6 = vadd.f32 %v1514_v40, %v552_v2  ;;  %v1003_v7 = vadd.f32 %v1514_v40, %v680_v3 }
 0x102   :  { %v1269_v8 = vpop.f32.mrf.mxu0  ;;  %v1301_v9 = vpop.f32.mrf.mxu1 }
 0x103   :  { %1101 = vst [vmem:[%s1775_s3 + $0x78] sm:$0xff] %v1037_v4  ;;  %1133 = vst [vmem:[%s1775_s3 + $0x178] sm:$0xff] %v1069_v5  ;;  %v1035_v10 = vmax.f32 %v971_v6, 0.0  ;;  %v1067_v11 = vmax.f32 %v1003_v7, 0.0  ;;  %v976_v12 = vadd.f32 %v1269_v8, %v1514_v40  ;;  %v1008_v13 = vadd.f32 %v1301_v9, %v1514_v40 }
 0x104   :  { %v565_v14 = vpop.f32.mrf.mxu0  ;;  %v693_v15 = vpop.f32.mrf.mxu1 }
 0x105   :  { %1099 = vst [vmem:[%s1775_s3 + $0x68] sm:$0xff] %v1035_v10  ;;  %1131 = vst [vmem:[%s1775_s3 + $0x168] sm:$0xff] %v1067_v11  ;;  %v1040_v16 = vmax.f32 %v976_v12, 0.0  ;;  %v1072_v17 = vmax.f32 %v1008_v13, 0.0  ;;  %v974_v18 = vadd.f32 %v1514_v40, %v565_v14  ;;  %v1006_v19 = vadd.f32 %v1514_v40, %v693_v15 }
 0x106   :  { %v1270_v20 = vpop.f32.mrf.mxu0  ;;  %v1302_v21 = vpop.f32.mrf.mxu1 }
 0x107   :  { %1104 = vst [vmem:[%s1775_s3 + $0x90] sm:$0xff] %v1040_v16  ;;  %1136 = vst [vmem:[%s1775_s3 + $0x190] sm:$0xff] %v1072_v17  ;;  %v1038_v22 = vmax.f32 %v974_v18, 0.0  ;;  %v1070_v23 = vmax.f32 %v1006_v19, 0.0  ;;  %v977_v24 = vadd.f32 %v1270_v20, %v1514_v40  ;;  %v1009_v25 = vadd.f32 %v1302_v21, %v1514_v40 }
 0x108   :  { %v568_v26 = vpop.f32.mrf.mxu0  ;;  %v696_v27 = vpop.f32.mrf.mxu1 }
 0x109   :  { %1102 = vst [vmem:[%s1775_s3 + $0x80] sm:$0xff] %v1038_v22  ;;  %1134 = vst [vmem:[%s1775_s3 + $0x180] sm:$0xff] %v1070_v23  ;;  %v1041_v28 = vmax.f32 %v977_v24, 0.0  ;;  %v1073_v29 = vmax.f32 %v1009_v25, 0.0  ;;  %v975_v30 = vadd.f32 %v1514_v40, %v568_v26  ;;  %v1007_v31 = vadd.f32 %v1514_v40, %v696_v27 }
 0x10a   :  { %v1273_v32 = vpop.f32.mrf.mxu0  ;;  %v1305_v33 = vpop.f32.mrf.mxu1 }
 0x10b   :  { %1105 = vst [vmem:[%s1775_s3 + $0x98] sm:$0xff] %v1041_v28  ;;  %1137 = vst [vmem:[%s1775_s3 + $0x198] sm:$0xff] %v1073_v29  ;;  %v1039_v34 = vmax.f32 %v975_v30, 0.0  ;;  %v1071_v35 = vmax.f32 %v1007_v31, 0.0  ;;  %v980_v36 = vadd.f32 %v1273_v32, %v1514_v40  ;;  %v1012_v37 = vadd.f32 %v1305_v33, %v1514_v40 }
 0x10c   :  { %v581_v38 = vpop.f32.mrf.mxu0  ;;  %v709_v39 = vpop.f32.mrf.mxu1 }
 0x10d   :  { %1103 = vst [vmem:[%s1775_s3 + $0x88] sm:$0xff] %v1039_v34  ;;  %1135 = vst [vmem:[%s1775_s3 + $0x188] sm:$0xff] %v1071_v35  ;;  %v1044_v41 = vmax.f32 %v980_v36, 0.0  ;;  %v1076_v42 = vmax.f32 %v1012_v37, 0.0  ;;  %v978_v43 = vadd.f32 %v1514_v40, %v581_v38  ;;  %v1010_v44 = vadd.f32 %v1514_v40, %v709_v39 }
 0x10e   :  { %v1274_v45 = vpop.f32.mrf.mxu0  ;;  %v1306_v46 = vpop.f32.mrf.mxu1 }
 0x10f   :  { %1108 = vst [vmem:[%s1775_s3 + $0xb0] sm:$0xff] %v1044_v41  ;;  %1140 = vst [vmem:[%s1775_s3 + $0x1b0] sm:$0xff] %v1076_v42  ;;  %v1042_v47 = vmax.f32 %v978_v43, 0.0  ;;  %v1074_v48 = vmax.f32 %v1010_v44, 0.0  ;;  %v981_v49 = vadd.f32 %v1274_v45, %v1514_v40  ;;  %v1013_v50 = vadd.f32 %v1306_v46, %v1514_v40 }
 0x110   :  { %v584_v51 = vpop.f32.mrf.mxu0  ;;  %v712_v52 = vpop.f32.mrf.mxu1 }
 0x111   :  { %1106 = vst [vmem:[%s1775_s3 + $0xa0] sm:$0xff] %v1042_v47  ;;  %1138 = vst [vmem:[%s1775_s3 + $0x1a0] sm:$0xff] %v1074_v48  ;;  %v1045_v53 = vmax.f32 %v981_v49, 0.0  ;;  %v1077_v54 = vmax.f32 %v1013_v50, 0.0  ;;  %v979_v55 = vadd.f32 %v1514_v40, %v584_v51  ;;  %v1011_v56 = vadd.f32 %v1514_v40, %v712_v52 }
 0x112   :  { %v1277_v57 = vpop.f32.mrf.mxu0  ;;  %v1309_v58 = vpop.f32.mrf.mxu1 }
 0x113   :  { %1109 = vst [vmem:[%s1775_s3 + $0xb8] sm:$0xff] %v1045_v53  ;;  %1141 = vst [vmem:[%s1775_s3 + $0x1b8] sm:$0xff] %v1077_v54  ;;  %v1043_v59 = vmax.f32 %v979_v55, 0.0  ;;  %v1075_v60 = vmax.f32 %v1011_v56, 0.0  ;;  %v984_v61 = vadd.f32 %v1277_v57, %v1514_v40  ;;  %v1016_v62 = vadd.f32 %v1309_v58, %v1514_v40 }
 0x114   :  { %v597_v63 = vpop.f32.mrf.mxu0  ;;  %v725_v0 = vpop.f32.mrf.mxu1 }
 0x115   :  { %1107 = vst [vmem:[%s1775_s3 + $0xa8] sm:$0xff] %v1043_v59  ;;  %1139 = vst [vmem:[%s1775_s3 + $0x1a8] sm:$0xff] %v1075_v60  ;;  %v1048_v1 = vmax.f32 %v984_v61, 0.0  ;;  %v1080_v2 = vmax.f32 %v1016_v62, 0.0  ;;  %v982_v3 = vadd.f32 %v1514_v40, %v597_v63  ;;  %v1014_v4 = vadd.f32 %v1514_v40, %v725_v0 }
 0x116   :  { %v1278_v5 = vpop.f32.mrf.mxu0  ;;  %v1310_v6 = vpop.f32.mrf.mxu1 }
 0x117   :  { %1112 = vst [vmem:[%s1775_s3 + $0xd0] sm:$0xff] %v1048_v1  ;;  %1144 = vst [vmem:[%s1775_s3 + $0x1d0] sm:$0xff] %v1080_v2  ;;  %v1046_v7 = vmax.f32 %v982_v3, 0.0  ;;  %v1078_v8 = vmax.f32 %v1014_v4, 0.0  ;;  %v985_v9 = vadd.f32 %v1278_v5, %v1514_v40  ;;  %v1017_v10 = vadd.f32 %v1310_v6, %v1514_v40 }
 0x118   :  { %v600_v11 = vpop.f32.mrf.mxu0  ;;  %v728_v12 = vpop.f32.mrf.mxu1 }
 0x119   :  { %1110 = vst [vmem:[%s1775_s3 + $0xc0] sm:$0xff] %v1046_v7  ;;  %1142 = vst [vmem:[%s1775_s3 + $0x1c0] sm:$0xff] %v1078_v8  ;;  %v1049_v13 = vmax.f32 %v985_v9, 0.0  ;;  %v1081_v14 = vmax.f32 %v1017_v10, 0.0  ;;  %v983_v15 = vadd.f32 %v1514_v40, %v600_v11  ;;  %v1015_v16 = vadd.f32 %v1514_v40, %v728_v12 }
 0x11a   :  { %v1281_v17 = vpop.f32.mrf.mxu0  ;;  %v1313_v18 = vpop.f32.mrf.mxu1 }
 0x11b   :  { %1113 = vst [vmem:[%s1775_s3 + $0xd8] sm:$0xff] %v1049_v13  ;;  %1145 = vst [vmem:[%s1775_s3 + $0x1d8] sm:$0xff] %v1081_v14  ;;  %v1047_v19 = vmax.f32 %v983_v15, 0.0  ;;  %v1079_v20 = vmax.f32 %v1015_v16, 0.0  ;;  %v988_v21 = vadd.f32 %v1281_v17, %v1514_v40  ;;  %v1020_v22 = vadd.f32 %v1313_v18, %v1514_v40 }
 0x11c   :  { %v613_v23 = vpop.f32.mrf.mxu0  ;;  %v741_v24 = vpop.f32.mrf.mxu1 }
 0x11d   :  { %1111 = vst [vmem:[%s1775_s3 + $0xc8] sm:$0xff] %v1047_v19  ;;  %1143 = vst [vmem:[%s1775_s3 + $0x1c8] sm:$0xff] %v1079_v20  ;;  %v1052_v25 = vmax.f32 %v988_v21, 0.0  ;;  %v1084_v26 = vmax.f32 %v1020_v22, 0.0  ;;  %v986_v27 = vadd.f32 %v1514_v40, %v613_v23  ;;  %v1018_v28 = vadd.f32 %v1514_v40, %v741_v24 }
 0x11e   :  { %v1282_v29 = vpop.f32.mrf.mxu0  ;;  %v1314_v30 = vpop.f32.mrf.mxu1 }
 0x11f   :  { %1116 = vst [vmem:[%s1775_s3 + $0xf0] sm:$0xff] %v1052_v25  ;;  %1148 = vst [vmem:[%s1775_s3 + $0x1f0] sm:$0xff] %v1084_v26  ;;  %v1050_v31 = vmax.f32 %v986_v27, 0.0  ;;  %v1082_v32 = vmax.f32 %v1018_v28, 0.0  ;;  %v989_v33 = vadd.f32 %v1282_v29, %v1514_v40  ;;  %v1021_v34 = vadd.f32 %v1314_v30, %v1514_v40 }
 0x120   :  { %v616_v35 = vpop.f32.mrf.mxu0  ;;  %v744_v36 = vpop.f32.mrf.mxu1 }
 0x121   :  { %1114 = vst [vmem:[%s1775_s3 + $0xe0] sm:$0xff] %v1050_v31  ;;  %1146 = vst [vmem:[%s1775_s3 + $0x1e0] sm:$0xff] %v1082_v32  ;;  %v1053_v37 = vmax.f32 %v989_v33, 0.0  ;;  %v1085_v38 = vmax.f32 %v1021_v34, 0.0  ;;  %v987_v39 = vadd.f32 %v1514_v40, %v616_v35  ;;  %v1019_v41 = vadd.f32 %v1514_v40, %v744_v36 }
 0x123   :  { %1117 = vst [vmem:[%s1775_s3 + $0xf8] sm:$0xff] %v1053_v37  ;;  %1149 = vst [vmem:[%s1775_s3 + $0x1f8] sm:$0xff] %v1085_v38  ;;  %v1051_v42 = vmax.f32 %v987_v39, 0.0  ;;  %v1083_v43 = vmax.f32 %v1019_v41, 0.0 }
 0x125   :  { %1115 = vst [vmem:[%s1775_s3 + $0xe8] sm:$0xff] %v1051_v42  ;;  %1147 = vst [vmem:[%s1775_s3 + $0x1e8] sm:$0xff] %v1083_v43 }

// kernel: faster_rcnn_forward.6
= control target key start
LH: loop header
LB: loop body
LE: loop exit
PB: predicated region body
PF: predicated region fallthrough
CT: control target
= control target key end

     0   :  { %s820_s1 = inlined_call_operand.vmem [shape: bf16[256,128], index: 1, kind: input, shape index: {}]   ;;  %s821_s0 = inlined_call_operand.vmem [shape: bf16[128,256], index: 0, kind: input, shape index: {}]   ;;  %s822_s2 = inlined_call_operand.vmem [shape: f32[1,128], index: 2, kind: input, shape index: {}]   ;;  %s823_s3 = inlined_call_operand.vmem [shape: f32[128,128], index: 3, kind: output, shape index: {}]  }
   0x1   :  { %v595_v0 = vld [vmem:[%s820_s1 + $0x78] sm:$0xff]   ;;  %v597_v2 = vld [vmem:[%s820_s1 + $0x70] sm:$0xff]   ;;  %v599_v4 = vld [vmem:[%s820_s1 + $0x68] sm:$0xff]  }
   0x2   :  { %v596_v1 = vld [vmem:[%s820_s1 + $0x38] sm:$0xff]   ;;  %515 = vmatprep.subr.bf16.mxu0 %v595_v0  ;;  %579 = vmatprep.subr.bf16.mxu1 %v595_v0  ;;  %v598_v3 = vld [vmem:[%s820_s1 + $0x30] sm:$0xff]   ;;  %v600_v5 = vld [vmem:[%s820_s1 + $0x28] sm:$0xff]  }
   0x3   :  { %516 = vmatpush3.bf16.msra.mxu0 %v596_v1  ;;  %587 = vmatpush3.bf16.msra.mxu1 %v596_v1  ;;  %v601_v6 = vld [vmem:[%s820_s1 + $0x60] sm:$0xff]   ;;  %v603_v8 = vld [vmem:[%s820_s1 + $0x58] sm:$0xff]   ;;  %v605_v10 = vld [vmem:[%s820_s1 + $0x50] sm:$0xff]  }
   0x4   :  { %517 = vmatprep.subr.bf16.mxu0 %v597_v2  ;;  %580 = vmatprep.subr.bf16.mxu1 %v597_v2  ;;  %v602_v7 = vld [vmem:[%s820_s1 + $0x20] sm:$0xff]   ;;  %v604_v9 = vld [vmem:[%s820_s1 + $0x18] sm:$0xff]   ;;  %v606_v13 = vld [vmem:[%s820_s1 + $0x10] sm:$0xff]  }
   0x5   :  { %v613_v11 = vld [vmem:[%s821_s0 + $0x4] ss:$8 sps:$4 sm:$0xff]   ;;  %v611_v18 = vld [vmem:[%s821_s0] ss:$8 sps:$4 sm:$0xff]   ;;  %v617_v20 = vld [vmem:[%s821_s0 + $0x14] ss:$8 sps:$4 sm:$0xff]  }
   0x6   :  { %v616_v12 = vld [vmem:[%s821_s0 + $0x44] ss:$8 sps:$4 sm:$0xff]   ;;  %307 = vmatprep.mubr.bf16.mxu0 %v613_v11  ;;  %v614_v19 = vld [vmem:[%s821_s0 + $0x40] ss:$8 sps:$4 sm:$0xff]   ;;  %v619_v21 = vld [vmem:[%s821_s0 + $0x54] ss:$8 sps:$4 sm:$0xff]  }
   0x7   :  { %518 = vmatpush3.bf16.msra.mxu0 %v598_v3  ;;  %588 = vmatpush3.bf16.msra.mxu1 %v598_v3  ;;  %v607_v14 = vld [vmem:[%s820_s1 + $0x48] sm:$0xff]   ;;  %v609_v16 = vld [vmem:[%s820_s1 + $0x40] sm:$0xff]   ;;  %v621_v22 = vld [vmem:[%s821_s0 + $0x10] ss:$8 sps:$4 sm:$0xff]  }
   0x8   :  { %519 = vmatprep.subr.bf16.mxu0 %v599_v4  ;;  %581 = vmatprep.subr.bf16.mxu1 %v599_v4  ;;  %v608_v15 = vld [vmem:[%s820_s1 + $0x8] sm:$0xff]   ;;  %v610_v17 = vld [vmem:[%s820_s1] sm:$0xff]   ;;  %v622_v23 = vld [vmem:[%s821_s0 + $0x50] ss:$8 sps:$4 sm:$0xff]  }
   0x9   :  { %339 = vmatprep.mubr.bf16.mxu1 %v616_v12  ;;  %v623_v24 = vld [vmem:[%s821_s0 + $0x24] ss:$8 sps:$4 sm:$0xff]   ;;  %v627_v26 = vld [vmem:[%s821_s0 + $0x20] ss:$8 sps:$4 sm:$0xff]   ;;  %v629_v28 = vld [vmem:[%s821_s0 + $0x34] ss:$8 sps:$4 sm:$0xff]  }
   0xa   :  { %v625_v25 = vld [vmem:[%s821_s0 + $0x64] ss:$8 sps:$4 sm:$0xff]   ;;  %v628_v27 = vld [vmem:[%s821_s0 + $0x60] ss:$8 sps:$4 sm:$0xff]   ;;  %v631_v29 = vld [vmem:[%s821_s0 + $0x74] ss:$8 sps:$4 sm:$0xff]  }
   0xb   :  { %520 = vmatpush3.bf16.msra.mxu0 %v600_v5  ;;  %589 = vmatpush3.bf16.msra.mxu1 %v600_v5  ;;  %v633_v30 = vld [vmem:[%s821_s0 + $0x30] ss:$8 sps:$4 sm:$0xff]   ;;  %v754_v35 = vld [vmem:[%s822_s2] ss:$0 sm:$0xff] }
   0xc   :  { %521 = vmatprep.subr.bf16.mxu0 %v601_v6  ;;  %582 = vmatprep.subr.bf16.mxu1 %v601_v6  ;;  %v634_v31 = vld [vmem:[%s821_s0 + $0x70] ss:$8 sps:$4 sm:$0xff]  }
   0xf   :  { %522 = vmatpush3.bf16.msra.mxu0 %v602_v7  ;;  %590 = vmatpush3.bf16.msra.mxu1 %v602_v7 }
  0x10   :  { %523 = vmatprep.subr.bf16.mxu0 %v603_v8  ;;  %583 = vmatprep.subr.bf16.mxu1 %v603_v8 }
  0x13   :  { %524 = vmatpush3.bf16.msra.mxu0 %v604_v9  ;;  %591 = vmatpush3.bf16.msra.mxu1 %v604_v9 }
  0x14   :  { %525 = vmatprep.subr.bf16.mxu0 %v605_v10  ;;  %584 = vmatprep.subr.bf16.mxu1 %v605_v10 }
  0x17   :  { %526 = vmatpush3.bf16.msra.mxu0 %v606_v13  ;;  %592 = vmatpush3.bf16.msra.mxu1 %v606_v13 }
  0x18   :  { %527 = vmatprep.subr.bf16.mxu0 %v607_v14  ;;  %585 = vmatprep.subr.bf16.mxu1 %v607_v14 }
  0x1b   :  { %528 = vmatpush3.bf16.msra.mxu0 %v608_v15  ;;  %593 = vmatpush3.bf16.msra.mxu1 %v608_v15 }
  0x1c   :  { %529 = vmatprep.subr.bf16.mxu0 %v609_v16  ;;  %586 = vmatprep.subr.bf16.mxu1 %v609_v16 }
  0x1f   :  { %530 = vmatpush3.bf16.msra.mxu0 %v610_v17  ;;  %594 = vmatpush3.bf16.msra.mxu1 %v610_v17 }
  0x22   :  { %308 = vmatmul.mubr.bf16.vlgmr.msra.gmra.mxu0 %v611_v18  ;;  %340 = vmatmul.mubr.bf16.vlgmr.msra.gmra.mxu1 %v614_v19 }
  0x23   :  { %315 = vmatprep.mubr.bf16.mxu0 %v617_v20  ;;  %347 = vmatprep.mubr.bf16.mxu1 %v619_v21 }
  0x2a   :  { %316 = vmatmul.mubr.bf16.gmra.mxu0 %v621_v22  ;;  %348 = vmatmul.mubr.bf16.gmra.mxu1 %v622_v23 }
  0x2b   :  { %323 = vmatprep.mubr.bf16.mxu0 %v623_v24  ;;  %355 = vmatprep.mubr.bf16.mxu1 %v625_v25 }
  0x32   :  { %324 = vmatmul.mubr.bf16.gmra.mxu0 %v627_v26  ;;  %356 = vmatmul.mubr.bf16.gmra.mxu1 %v628_v27 }
  0x33   :  { %331 = vmatprep.mubr.bf16.mxu0 %v629_v28  ;;  %363 = vmatprep.mubr.bf16.mxu1 %v631_v29 }
  0x3a   :  { %332 = vmatmul.mubr.bf16.gmra.mxu0 %v633_v30  ;;  %364 = vmatmul.mubr.bf16.gmra.mxu1 %v634_v31 }
  0xe2   :  { %v531_v32 = vpop.f32.mrf.mxu0  ;;  %v555_v33 = vpop.f32.mrf.mxu1 }
  0xe4   :  { %v532_v34 = vpop.f32.mrf.mxu0  ;;  %v556_v36 = vpop.f32.mrf.mxu1 }
  0xe5   :  { %v533_v37 = vadd.f32 %v532_v34, %v531_v32  ;;  %v557_v38 = vadd.f32 %v556_v36, %v555_v33 }
  0xe6   :  { %v534_v39 = vpop.f32.mrf.mxu0  ;;  %v558_v40 = vpop.f32.mrf.mxu1 }
  0xe7   :  { %v430_v41 = vadd.f32 %v533_v37, %v754_v35  ;;  %v438_v42 = vadd.f32 %v557_v38, %v754_v35 }
  0xe8   :  { %v535_v43 = vpop.f32.mrf.mxu0  ;;  %v559_v44 = vpop.f32.mrf.mxu1 }
  0xe9   :  { %v446_v45 = vmax.f32 %v430_v41, 0.0  ;;  %v454_v46 = vmax.f32 %v438_v42, 0.0  ;;  %v536_v47 = vadd.f32 %v535_v43, %v534_v39  ;;  %v560_v48 = vadd.f32 %v559_v44, %v558_v40 }
  0xea   :  { %v537_v49 = vpop.f32.mrf.mxu0  ;;  %v561_v50 = vpop.f32.mrf.mxu1 }
  0xeb   :  { %462 = vst [vmem:[%s823_s3] sm:$0xff] %v446_v45  ;;  %470 = vst [vmem:[%s823_s3 + $0x40] sm:$0xff] %v454_v46  ;;  %v431_v51 = vadd.f32 %v536_v47, %v754_v35  ;;  %v439_v52 = vadd.f32 %v560_v48, %v754_v35 }
  0xec   :  { %v538_v53 = vpop.f32.mrf.mxu0  ;;  %v562_v54 = vpop.f32.mrf.mxu1 }
  0xed   :  { %v447_v55 = vmax.f32 %v431_v51, 0.0  ;;  %v455_v56 = vmax.f32 %v439_v52, 0.0  ;;  %v539_v57 = vadd.f32 %v538_v53, %v537_v49  ;;  %v563_v58 = vadd.f32 %v562_v54, %v561_v50 }
  0xee   :  { %v540_v59 = vpop.f32.mrf.mxu0  ;;  %v564_v60 = vpop.f32.mrf.mxu1 }
  0xef   :  { %463 = vst [vmem:[%s823_s3 + $0x8] sm:$0xff] %v447_v55  ;;  %471 = vst [vmem:[%s823_s3 + $0x48] sm:$0xff] %v455_v56  ;;  %v432_v61 = vadd.f32 %v539_v57, %v754_v35  ;;  %v440_v62 = vadd.f32 %v563_v58, %v754_v35 }
  0xf0   :  { %v541_v63 = vpop.f32.mrf.mxu0  ;;  %v565_v0 = vpop.f32.mrf.mxu1 }
  0xf1   :  { %v448_v1 = vmax.f32 %v432_v61, 0.0  ;;  %v456_v2 = vmax.f32 %v440_v62, 0.0  ;;  %v542_v3 = vadd.f32 %v541_v63, %v540_v59  ;;  %v566_v4 = vadd.f32 %v565_v0, %v564_v60 }
  0xf2   :  { %v543_v5 = vpop.f32.mrf.mxu0  ;;  %v567_v6 = vpop.f32.mrf.mxu1 }
  0xf3   :  { %464 = vst [vmem:[%s823_s3 + $0x10] sm:$0xff] %v448_v1  ;;  %472 = vst [vmem:[%s823_s3 + $0x50] sm:$0xff] %v456_v2  ;;  %v433_v7 = vadd.f32 %v542_v3, %v754_v35  ;;  %v441_v8 = vadd.f32 %v566_v4, %v754_v35 }
  0xf4   :  { %v544_v9 = vpop.f32.mrf.mxu0  ;;  %v568_v10 = vpop.f32.mrf.mxu1 }
  0xf5   :  { %v449_v11 = vmax.f32 %v433_v7, 0.0  ;;  %v457_v12 = vmax.f32 %v441_v8, 0.0  ;;  %v545_v13 = vadd.f32 %v544_v9, %v543_v5  ;;  %v569_v14 = vadd.f32 %v568_v10, %v567_v6 }
  0xf6   :  { %v546_v15 = vpop.f32.mrf.mxu0  ;;  %v570_v16 = vpop.f32.mrf.mxu1 }
  0xf7   :  { %465 = vst [vmem:[%s823_s3 + $0x18] sm:$0xff] %v449_v11  ;;  %473 = vst [vmem:[%s823_s3 + $0x58] sm:$0xff] %v457_v12  ;;  %v434_v17 = vadd.f32 %v545_v13, %v754_v35  ;;  %v442_v18 = vadd.f32 %v569_v14, %v754_v35 }
  0xf8   :  { %v547_v19 = vpop.f32.mrf.mxu0  ;;  %v571_v20 = vpop.f32.mrf.mxu1 }
  0xf9   :  { %v450_v21 = vmax.f32 %v434_v17, 0.0  ;;  %v458_v22 = vmax.f32 %v442_v18, 0.0  ;;  %v548_v23 = vadd.f32 %v547_v19, %v546_v15  ;;  %v572_v24 = vadd.f32 %v571_v20, %v570_v16 }
  0xfa   :  { %v549_v25 = vpop.f32.mrf.mxu0  ;;  %v573_v26 = vpop.f32.mrf.mxu1 }
  0xfb   :  { %466 = vst [vmem:[%s823_s3 + $0x20] sm:$0xff] %v450_v21  ;;  %474 = vst [vmem:[%s823_s3 + $0x60] sm:$0xff] %v458_v22  ;;  %v435_v27 = vadd.f32 %v548_v23, %v754_v35  ;;  %v443_v28 = vadd.f32 %v572_v24, %v754_v35 }
  0xfc   :  { %v550_v29 = vpop.f32.mrf.mxu0  ;;  %v574_v30 = vpop.f32.mrf.mxu1 }
  0xfd   :  { %v451_v31 = vmax.f32 %v435_v27, 0.0  ;;  %v459_v32 = vmax.f32 %v443_v28, 0.0  ;;  %v551_v33 = vadd.f32 %v550_v29, %v549_v25  ;;  %v575_v34 = vadd.f32 %v574_v30, %v573_v26 }
  0xfe   :  { %v552_v36 = vpop.f32.mrf.mxu0  ;;  %v576_v37 = vpop.f32.mrf.mxu1 }
  0xff   :  { %467 = vst [vmem:[%s823_s3 + $0x28] sm:$0xff] %v451_v31  ;;  %475 = vst [vmem:[%s823_s3 + $0x68] sm:$0xff] %v459_v32  ;;  %v436_v38 = vadd.f32 %v551_v33, %v754_v35  ;;  %v444_v39 = vadd.f32 %v575_v34, %v754_v35 }
 0x100   :  { %v553_v40 = vpop.f32.mrf.mxu0  ;;  %v577_v41 = vpop.f32.mrf.mxu1 }
 0x101   :  { %v452_v42 = vmax.f32 %v436_v38, 0.0  ;;  %v460_v43 = vmax.f32 %v444_v39, 0.0  ;;  %v554_v44 = vadd.f32 %v553_v40, %v552_v36  ;;  %v578_v45 = vadd.f32 %v577_v41, %v576_v37 }
 0x103   :  { %468 = vst [vmem:[%s823_s3 + $0x30] sm:$0xff] %v452_v42  ;;  %476 = vst [vmem:[%s823_s3 + $0x70] sm:$0xff] %v460_v43  ;;  %v437_v46 = vadd.f32 %v554_v44, %v754_v35  ;;  %v445_v47 = vadd.f32 %v578_v45, %v754_v35 }
 0x105   :  { %v453_v48 = vmax.f32 %v437_v46, 0.0  ;;  %v461_v49 = vmax.f32 %v445_v47, 0.0 }
 0x107   :  { %469 = vst [vmem:[%s823_s3 + $0x38] sm:$0xff] %v453_v48  ;;  %477 = vst [vmem:[%s823_s3 + $0x78] sm:$0xff] %v461_v49 }

// kernel: faster_rcnn_forward.7
= control target key start
LH: loop header
LB: loop body
LE: loop exit
PB: predicated region body
PF: predicated region fallthrough
CT: control target
= control target key end

     0   :  { %s1157_s1 = inlined_call_operand.vmem [shape: bf16[384,128], index: 1, kind: input, shape index: {}]   ;;  %s1158_s0 = inlined_call_operand.vmem [shape: bf16[128,384], index: 0, kind: input, shape index: {}]   ;;  %s1159_s2 = inlined_call_operand.vmem [shape: f32[1,128], index: 2, kind: input, shape index: {}]   ;;  %s1160_s3 = inlined_call_operand.vmem [shape: f32[128,128], index: 3, kind: output, shape index: {}]  }
   0x1   :  { %v868_v0 = vld [vmem:[%s1157_s1 + $0x78] sm:$0xff]   ;;  %v871_v3 = vld [vmem:[%s1157_s1 + $0x70] sm:$0xff]   ;;  %v874_v6 = vld [vmem:[%s1157_s1 + $0x68] sm:$0xff]  }
   0x2   :  { %v869_v1 = vld [vmem:[%s1157_s1 + $0x38] sm:$0xff]   ;;  %756 = vmatprep.subr.bf16.mxu0 %v868_v0  ;;  %v872_v4 = vld [vmem:[%s1157_s1 + $0x30] sm:$0xff]   ;;  %v875_v7 = vld [vmem:[%s1157_s1 + $0x28] sm:$0xff]  }
   0x3   :  { %v870_v2 = vld [vmem:[%s1157_s1 + $0xb8] sm:$0xff]   ;;  %757 = vmatpush3.bf16.msra.mxu0 %v869_v1  ;;  %v873_v5 = vld [vmem:[%s1157_s1 + $0xb0] sm:$0xff]   ;;  %v876_v8 = vld [vmem:[%s1157_s1 + $0xa8] sm:$0xff]  }
   0x4   :  { %836 = vmatprep.subr.bf16.mxu1 %v870_v2  ;;  %758 = vmatprep.subr.bf16.mxu0 %v871_v3  ;;  %v877_v9 = vld [vmem:[%s1157_s1 + $0x60] sm:$0xff]   ;;  %v880_v12 = vld [vmem:[%s1157_s1 + $0x58] sm:$0xff]   ;;  %v883_v15 = vld [vmem:[%s1157_s1 + $0x50] sm:$0xff]  }
   0x5   :  { %837 = vmatpush3.bf16.msra.mxu1 %v870_v2  ;;  %v878_v10 = vld [vmem:[%s1157_s1 + $0x20] sm:$0xff]   ;;  %v882_v13 = vld [vmem:[%s1157_s1 + $0x98] sm:$0xff]   ;;  %v885_v16 = vld [vmem:[%s1157_s1 + $0x90] sm:$0xff]  }
   0x6   :  { %838 = vmatprep.subr.bf16.mxu1 %v873_v5  ;;  %v879_v11 = vld [vmem:[%s1157_s1 + $0xa0] sm:$0xff]   ;;  %v881_v14 = vld [vmem:[%s1157_s1 + $0x18] sm:$0xff]   ;;  %v884_v17 = vld [vmem:[%s1157_s1 + $0x10] sm:$0xff]  }
   0x7   :  { %759 = vmatpush3.bf16.msra.mxu0 %v872_v4  ;;  %v886_v18 = vld [vmem:[%s1157_s1 + $0x48] sm:$0xff]   ;;  %v889_v21 = vld [vmem:[%s1157_s1 + $0x40] sm:$0xff]   ;;  %v904_v32 = vld [vmem:[%s1158_s0 + $0x50] ss:$12 sps:$4 sm:$0xff]  }
   0x8   :  { %760 = vmatprep.subr.bf16.mxu0 %v874_v6  ;;  %v887_v19 = vld [vmem:[%s1157_s1 + $0x8] sm:$0xff]   ;;  %v891_v22 = vld [vmem:[%s1157_s1 + $0x80] sm:$0xff]   ;;  %v902_v34 = vld [vmem:[%s1158_s0 + $0x30] ss:$12 sps:$4 sm:$0xff]  }
   0x9   :  { %839 = vmatpush3.bf16.msra.mxu1 %v873_v5  ;;  %v888_v20 = vld [vmem:[%s1157_s1 + $0x88] sm:$0xff]   ;;  %v894_v23 = vld [vmem:[%s1158_s0 + $0x4] ss:$12 sps:$4 sm:$0xff]   ;;  %v900_v31 = vld [vmem:[%s1158_s0 + $0x34] ss:$12 sps:$4 sm:$0xff]  }
   0xa   :  { %840 = vmatprep.subr.bf16.mxu1 %v876_v8  ;;  %v895_v24 = vld [vmem:[%s1158_s0 + $0x8] ss:$12 sps:$4 sm:$0xff]   ;;  %v890_v25 = vld [vmem:[%s1157_s1] sm:$0xff]   ;;  %435 = vmatprep.mubr.bf16.mxu0 %v894_v23  ;;  %v905_v35 = vld [vmem:[%s1158_s0 + $0x4c] ss:$12 sps:$4 sm:$0xff]  }
   0xb   :  { %761 = vmatpush3.bf16.msra.mxu0 %v875_v7  ;;  %852 = vmatprep.mubr.bf16.mxu1 %v895_v24  ;;  %v892_v26 = vld [vmem:[%s1158_s0] ss:$12 sps:$4 sm:$0xff]   ;;  %v897_v27 = vld [vmem:[%s1158_s0 + $0x1c] ss:$12 sps:$4 sm:$0xff]   ;;  %v903_v29 = vld [vmem:[%s1158_s0 + $0x38] ss:$12 sps:$4 sm:$0xff]  }
   0xc   :  { %762 = vmatprep.subr.bf16.mxu0 %v877_v9  ;;  %v896_v28 = vld [vmem:[%s1158_s0 + $0x20] ss:$12 sps:$4 sm:$0xff]   ;;  %v899_v30 = vld [vmem:[%s1158_s0 + $0x18] ss:$12 sps:$4 sm:$0xff]   ;;  %v911_v33 = vld [vmem:[%s1158_s0 + $0x68] ss:$12 sps:$4 sm:$0xff]  }
   0xd   :  { %841 = vmatpush3.bf16.msra.mxu1 %v876_v8  ;;  %v912_v36 = vld [vmem:[%s1158_s0 + $0x80] ss:$12 sps:$4 sm:$0xff]   ;;  %v919_v37 = vld [vmem:[%s1158_s0 + $0x98] ss:$12 sps:$4 sm:$0xff]   ;;  %v907_v38 = vld [vmem:[%s1158_s0 + $0x48] ss:$12 sps:$4 sm:$0xff]  }
   0xe   :  { %842 = vmatprep.subr.bf16.mxu1 %v879_v11  ;;  %v908_v39 = vld [vmem:[%s1158_s0 + $0x64] ss:$12 sps:$4 sm:$0xff]   ;;  %v910_v41 = vld [vmem:[%s1158_s0 + $0x60] ss:$12 sps:$4 sm:$0xff]   ;;  %v913_v42 = vld [vmem:[%s1158_s0 + $0x7c] ss:$12 sps:$4 sm:$0xff]  }
   0xf   :  { %763 = vmatpush3.bf16.msra.mxu0 %v878_v10  ;;  %v920_v40 = vld [vmem:[%s1158_s0 + $0xb0] ss:$12 sps:$4 sm:$0xff]   ;;  %v915_v43 = vld [vmem:[%s1158_s0 + $0x78] ss:$12 sps:$4 sm:$0xff]   ;;  %v916_v44 = vld [vmem:[%s1158_s0 + $0x94] ss:$12 sps:$4 sm:$0xff]  }
  0x10   :  { %764 = vmatprep.subr.bf16.mxu0 %v880_v12  ;;  %v918_v45 = vld [vmem:[%s1158_s0 + $0x90] ss:$12 sps:$4 sm:$0xff]   ;;  %v921_v46 = vld [vmem:[%s1158_s0 + $0xac] ss:$12 sps:$4 sm:$0xff]   ;;  %v923_v47 = vld [vmem:[%s1158_s0 + $0xa8] ss:$12 sps:$4 sm:$0xff]  }
  0x11   :  { %843 = vmatpush3.bf16.msra.mxu1 %v879_v11  ;;  %v1091_v54 = vld [vmem:[%s1159_s2] ss:$0 sm:$0xff] }
  0x12   :  { %844 = vmatprep.subr.bf16.mxu1 %v882_v13 }
  0x13   :  { %765 = vmatpush3.bf16.msra.mxu0 %v881_v14 }
  0x14   :  { %766 = vmatprep.subr.bf16.mxu0 %v883_v15 }
  0x15   :  { %845 = vmatpush3.bf16.msra.mxu1 %v882_v13 }
  0x16   :  { %846 = vmatprep.subr.bf16.mxu1 %v885_v16 }
  0x17   :  { %767 = vmatpush3.bf16.msra.mxu0 %v884_v17 }
  0x18   :  { %768 = vmatprep.subr.bf16.mxu0 %v886_v18 }
  0x19   :  { %847 = vmatpush3.bf16.msra.mxu1 %v885_v16 }
  0x1a   :  { %848 = vmatprep.subr.bf16.mxu1 %v888_v20 }
  0x1b   :  { %769 = vmatpush3.bf16.msra.mxu0 %v887_v19 }
  0x1c   :  { %770 = vmatprep.subr.bf16.mxu0 %v889_v21 }
  0x1d   :  { %849 = vmatpush3.bf16.msra.mxu1 %v888_v20 }
  0x1e   :  { %850 = vmatprep.subr.bf16.mxu1 %v891_v22 }
  0x1f   :  { %771 = vmatpush3.bf16.msra.mxu0 %v890_v25 }
  0x21   :  { %851 = vmatpush3.bf16.msra.mxu1 %v891_v22 }
  0x22   :  { %436 = vmatmul.mubr.bf16.vlgmr.msra.gmra.mxu0 %v892_v26 }
  0x23   :  { %443 = vmatprep.mubr.bf16.mxu0 %v897_v27 }
  0x24   :  { %853 = vmatmul.mubr.bf16.vlgmr.msra.gmra.mxu1 %v896_v28 }
  0x25   :  { %856 = vmatprep.mubr.bf16.mxu1 %v903_v29 }
  0x2a   :  { %444 = vmatmul.mubr.bf16.gmra.mxu0 %v899_v30 }
  0x2b   :  { %451 = vmatprep.mubr.bf16.mxu0 %v900_v31 }
  0x2c   :  { %857 = vmatmul.mubr.bf16.gmra.mxu1 %v904_v32 }
  0x2d   :  { %860 = vmatprep.mubr.bf16.mxu1 %v911_v33 }
  0x32   :  { %452 = vmatmul.mubr.bf16.gmra.mxu0 %v902_v34 }
  0x33   :  { %459 = vmatprep.mubr.bf16.mxu0 %v905_v35 }
  0x34   :  { %861 = vmatmul.mubr.bf16.gmra.mxu1 %v912_v36 }
  0x35   :  { %864 = vmatprep.mubr.bf16.mxu1 %v919_v37 }
  0x3a   :  { %460 = vmatmul.mubr.bf16.gmra.mxu0 %v907_v38 }
  0x3b   :  { %467 = vmatprep.mubr.bf16.mxu0 %v908_v39 }
  0x3c   :  { %865 = vmatmul.mubr.bf16.gmra.mxu1 %v920_v40 }
  0x42   :  { %468 = vmatmul.mubr.bf16.gmra.mxu0 %v910_v41 }
  0x43   :  { %475 = vmatprep.mubr.bf16.mxu0 %v913_v42 }
  0x4a   :  { %476 = vmatmul.mubr.bf16.gmra.mxu0 %v915_v43 }
  0x4b   :  { %483 = vmatprep.mubr.bf16.mxu0 %v916_v44 }
  0x52   :  { %484 = vmatmul.mubr.bf16.gmra.mxu0 %v918_v45 }
  0x53   :  { %491 = vmatprep.mubr.bf16.mxu0 %v921_v46 }
  0x5a   :  { %492 = vmatmul.mubr.bf16.gmra.mxu0 %v923_v47 }
  0xe2   :  { %v772_v48 = vpop.f32.mrf.mxu0 }
  0xe4   :  { %v773_v49 = vpop.f32.mrf.mxu0  ;;  %v854_v50 = vpop.f32.mrf.mxu1 }
  0xe5   :  { %v774_v51 = vadd.f32 %v773_v49, %v772_v48 }
  0xe6   :  { %v775_v52 = vpop.f32.mrf.mxu0  ;;  %v534_v53 = vpop.f32.mrf.mxu1 }
  0xe7   :  { %v535_v55 = vadd.f32 %v774_v51, %v534_v53 }
  0xe8   :  { %v776_v56 = vpop.f32.mrf.mxu0  ;;  %v855_v57 = vpop.f32.mrf.mxu1 }
  0xe9   :  { %v655_v58 = vadd.f32 %v1091_v54, %v535_v55  ;;  %v777_v59 = vadd.f32 %v776_v56, %v775_v52 }
  0xea   :  { %v778_v60 = vpop.f32.mrf.mxu0  ;;  %v537_v61 = vpop.f32.mrf.mxu1 }
  0xeb   :  { %v671_v62 = vmax.f32 %v655_v58, 0.0  ;;  %v538_v63 = vadd.f32 %v777_v59, %v537_v61 }
  0xec   :  { %v779_v0 = vpop.f32.mrf.mxu0  ;;  %v858_v1 = vpop.f32.mrf.mxu1 }
  0xed   :  { %687 = vst [vmem:[%s1160_s3] sm:$0xff] %v671_v62  ;;  %v656_v2 = vadd.f32 %v1091_v54, %v538_v63  ;;  %v780_v3 = vadd.f32 %v779_v0, %v778_v60 }
  0xee   :  { %v781_v4 = vpop.f32.mrf.mxu0  ;;  %v550_v8 = vpop.f32.mrf.mxu1 }
  0xef   :  { %v672_v5 = vmax.f32 %v656_v2, 0.0  ;;  %v543_v6 = vadd.f32 %v854_v50, %v780_v3 }
  0xf0   :  { %v782_v7 = vpop.f32.mrf.mxu0  ;;  %v859_v15 = vpop.f32.mrf.mxu1 }
  0xf1   :  { %688 = vst [vmem:[%s1160_s3 + $0x8] sm:$0xff] %v672_v5  ;;  %v657_v9 = vadd.f32 %v1091_v54, %v543_v6  ;;  %v783_v10 = vadd.f32 %v782_v7, %v781_v4 }
  0xf2   :  { %v784_v11 = vpop.f32.mrf.mxu0  ;;  %v553_v22 = vpop.f32.mrf.mxu1 }
  0xf3   :  { %v673_v12 = vmax.f32 %v657_v9, 0.0  ;;  %v546_v13 = vadd.f32 %v855_v57, %v783_v10 }
  0xf4   :  { %v785_v14 = vpop.f32.mrf.mxu0  ;;  %v862_v29 = vpop.f32.mrf.mxu1 }
  0xf5   :  { %689 = vst [vmem:[%s1160_s3 + $0x10] sm:$0xff] %v673_v12  ;;  %v658_v16 = vadd.f32 %v1091_v54, %v546_v13  ;;  %v786_v17 = vadd.f32 %v785_v14, %v784_v11 }
  0xf6   :  { %v787_v18 = vpop.f32.mrf.mxu0  ;;  %v566_v36 = vpop.f32.mrf.mxu1 }
  0xf7   :  { %v674_v19 = vmax.f32 %v658_v16, 0.0  ;;  %v551_v20 = vadd.f32 %v786_v17, %v550_v8 }
  0xf8   :  { %v788_v21 = vpop.f32.mrf.mxu0  ;;  %v863_v43 = vpop.f32.mrf.mxu1 }
  0xf9   :  { %690 = vst [vmem:[%s1160_s3 + $0x18] sm:$0xff] %v674_v19  ;;  %v659_v23 = vadd.f32 %v1091_v54, %v551_v20  ;;  %v789_v24 = vadd.f32 %v788_v21, %v787_v18 }
  0xfa   :  { %v790_v25 = vpop.f32.mrf.mxu0  ;;  %v569_v50 = vpop.f32.mrf.mxu1 }
  0xfb   :  { %v675_v26 = vmax.f32 %v659_v23, 0.0  ;;  %v554_v27 = vadd.f32 %v789_v24, %v553_v22 }
  0xfc   :  { %v791_v28 = vpop.f32.mrf.mxu0  ;;  %v866_v58 = vpop.f32.mrf.mxu1 }
  0xfd   :  { %691 = vst [vmem:[%s1160_s3 + $0x20] sm:$0xff] %v675_v26  ;;  %v660_v30 = vadd.f32 %v1091_v54, %v554_v27  ;;  %v792_v31 = vadd.f32 %v791_v28, %v790_v25 }
  0xfe   :  { %v793_v32 = vpop.f32.mrf.mxu0 }
  0xff   :  { %v676_v33 = vmax.f32 %v660_v30, 0.0  ;;  %v559_v34 = vadd.f32 %v858_v1, %v792_v31  ;;  %v582_v1 = vpop.f32.mrf.mxu1 }
 0x100   :  { %v794_v35 = vpop.f32.mrf.mxu0 }
 0x101   :  { %692 = vst [vmem:[%s1160_s3 + $0x28] sm:$0xff] %v676_v33  ;;  %v661_v37 = vadd.f32 %v1091_v54, %v559_v34  ;;  %v795_v38 = vadd.f32 %v794_v35, %v793_v32  ;;  %v867_v8 = vpop.f32.mrf.mxu1 }
 0x102   :  { %v796_v39 = vpop.f32.mrf.mxu0 }
 0x103   :  { %v677_v40 = vmax.f32 %v661_v37, 0.0  ;;  %v562_v41 = vadd.f32 %v859_v15, %v795_v38  ;;  %v585_v15 = vpop.f32.mrf.mxu1 }
 0x104   :  { %v797_v42 = vpop.f32.mrf.mxu0 }
 0x105   :  { %693 = vst [vmem:[%s1160_s3 + $0x30] sm:$0xff] %v677_v40  ;;  %v662_v44 = vadd.f32 %v1091_v54, %v562_v41  ;;  %v798_v45 = vadd.f32 %v797_v42, %v796_v39 }
 0x106   :  { %v799_v46 = vpop.f32.mrf.mxu0 }
 0x107   :  { %v678_v47 = vmax.f32 %v662_v44, 0.0  ;;  %v567_v48 = vadd.f32 %v798_v45, %v566_v36 }
 0x108   :  { %v800_v49 = vpop.f32.mrf.mxu0 }
 0x109   :  { %694 = vst [vmem:[%s1160_s3 + $0x38] sm:$0xff] %v678_v47  ;;  %v663_v51 = vadd.f32 %v1091_v54, %v567_v48  ;;  %v801_v52 = vadd.f32 %v800_v49, %v799_v46 }
 0x10a   :  { %v802_v53 = vpop.f32.mrf.mxu0 }
 0x10b   :  { %v679_v55 = vmax.f32 %v663_v51, 0.0  ;;  %v570_v56 = vadd.f32 %v801_v52, %v569_v50 }
 0x10c   :  { %v803_v57 = vpop.f32.mrf.mxu0 }
 0x10d   :  { %695 = vst [vmem:[%s1160_s3 + $0x40] sm:$0xff] %v679_v55  ;;  %v664_v59 = vadd.f32 %v1091_v54, %v570_v56  ;;  %v804_v60 = vadd.f32 %v803_v57, %v802_v53 }
 0x10e   :  { %v805_v61 = vpop.f32.mrf.mxu0 }
 0x10f   :  { %v680_v62 = vmax.f32 %v664_v59, 0.0  ;;  %v575_v63 = vadd.f32 %v862_v29, %v804_v60 }
 0x110   :  { %v806_v0 = vpop.f32.mrf.mxu0 }
 0x111   :  { %696 = vst [vmem:[%s1160_s3 + $0x48] sm:$0xff] %v680_v62  ;;  %v665_v2 = vadd.f32 %v1091_v54, %v575_v63  ;;  %v807_v3 = vadd.f32 %v806_v0, %v805_v61 }
 0x112   :  { %v808_v4 = vpop.f32.mrf.mxu0 }
 0x113   :  { %v681_v5 = vmax.f32 %v665_v2, 0.0  ;;  %v578_v6 = vadd.f32 %v863_v43, %v807_v3 }
 0x114   :  { %v809_v7 = vpop.f32.mrf.mxu0 }
 0x115   :  { %697 = vst [vmem:[%s1160_s3 + $0x50] sm:$0xff] %v681_v5  ;;  %v666_v9 = vadd.f32 %v1091_v54, %v578_v6  ;;  %v810_v10 = vadd.f32 %v809_v7, %v808_v4 }
 0x116   :  { %v811_v11 = vpop.f32.mrf.mxu0 }
 0x117   :  { %v682_v12 = vmax.f32 %v666_v9, 0.0  ;;  %v583_v13 = vadd.f32 %v810_v10, %v582_v1 }
 0x118   :  { %v812_v14 = vpop.f32.mrf.mxu0 }
 0x119   :  { %698 = vst [vmem:[%s1160_s3 + $0x58] sm:$0xff] %v682_v12  ;;  %v667_v16 = vadd.f32 %v1091_v54, %v583_v13  ;;  %v813_v17 = vadd.f32 %v812_v14, %v811_v11 }
 0x11a   :  { %v814_v18 = vpop.f32.mrf.mxu0 }
 0x11b   :  { %v683_v19 = vmax.f32 %v667_v16, 0.0  ;;  %v586_v20 = vadd.f32 %v813_v17, %v585_v15 }
 0x11c   :  { %v815_v21 = vpop.f32.mrf.mxu0 }
 0x11d   :  { %699 = vst [vmem:[%s1160_s3 + $0x60] sm:$0xff] %v683_v19  ;;  %v668_v22 = vadd.f32 %v1091_v54, %v586_v20  ;;  %v816_v23 = vadd.f32 %v815_v21, %v814_v18 }
 0x11e   :  { %v817_v24 = vpop.f32.mrf.mxu0 }
 0x11f   :  { %v684_v25 = vmax.f32 %v668_v22, 0.0  ;;  %v591_v26 = vadd.f32 %v866_v58, %v816_v23 }
 0x120   :  { %v818_v27 = vpop.f32.mrf.mxu0 }
 0x121   :  { %700 = vst [vmem:[%s1160_s3 + $0x68] sm:$0xff] %v684_v25  ;;  %v669_v28 = vadd.f32 %v1091_v54, %v591_v26  ;;  %v819_v29 = vadd.f32 %v818_v27, %v817_v24 }
 0x123   :  { %v685_v30 = vmax.f32 %v669_v28, 0.0  ;;  %v594_v31 = vadd.f32 %v867_v8, %v819_v29 }
 0x125   :  { %701 = vst [vmem:[%s1160_s3 + $0x70] sm:$0xff] %v685_v30  ;;  %v670_v32 = vadd.f32 %v1091_v54, %v594_v31 }
 0x127   :  { %v686_v33 = vmax.f32 %v670_v32, 0.0 }
 0x129   :  { %702 = vst [vmem:[%s1160_s3 + $0x78] sm:$0xff] %v686_v33 }

// kernel: squeeze.18
= control target key start
LH: loop header
LB: loop body
LE: loop exit
PB: predicated region body
PF: predicated region fallthrough
CT: control target
= control target key end

     0   :  { %vm5_vm0 = vcmask 1041409   ;;  %vm21_vm1 = vcmask 15360   ;;  %s878_s24 = smov 126   ;;  %s879_s25 = smov 120   ;;  %vm7_vm2 = vcmask 23552   ;;  %vm25_vm3 = vcmask 7168   ;;  %s1412_s0 = inlined_call_operand.vmem [shape: f32[2,8,8,3,1], index: 0, kind: input, shape index: {}]   ;;  %s1413_s1 = inlined_call_operand.vmem [shape: f32[2,192], index: 1, kind: output, shape index: {}]  }
   0x1   :  { %v686_v0 = vld [vmem:[%s1412_s0 + $0x2a] sm:$0x1]   ;;  %v692_v6 = vld [vmem:[%s1412_s0 + $0x28] sm:$0x1]   ;;  %v690_v8 = vld [vmem:[%s1412_s0 + $0x29] sm:$0x1]  }
   0x2   :  { %v687_v1 = vld [vmem:[%s1412_s0 + $0x69] sm:$0x2]   ;;  %v693_v7 = vld [vmem:[%s1412_s0 + $0x67] sm:$0x2]   ;;  %v691_v11 = vld [vmem:[%s1412_s0 + $0x68] sm:$0x2]  }
   0x3   :  { %v14_v2 = vsel %vm5_vm0, %v687_v1, %v686_v0  ;;  %v688_v3 = vld [vmem:[%s1412_s0 + $0x2a] sm:$0x1]   ;;  %v45_v10 = vsel %vm5_vm0, %v693_v7, %v692_v6  ;;  %v694_v12 = vld [vmem:[%s1412_s0 + $0x27] sm:$0x1]   ;;  %v35_v14 = vsel %vm5_vm0, %v691_v11, %v690_v8  ;;  %v696_v16 = vld [vmem:[%s1412_s0 + $0x26] sm:$0x1]  }
   0x4   :  { %v689_v4 = vld [vmem:[%s1412_s0 + $0x69] sm:$0x2]   ;;  %46 = vrot.lane.b32.xlu1 %v45_v10, %s879_s25  ;;  %v695_v13 = vld [vmem:[%s1412_s0 + $0x66] sm:$0x2]   ;;  %v697_v17 = vld [vmem:[%s1412_s0 + $0x65] sm:$0x2]  }
   0x5   :  { %v20_v5 = vsel %vm5_vm0, %v689_v4, %v688_v3  ;;  %v55_v15 = vsel %vm5_vm0, %v695_v13, %v694_v12  ;;  %v698_v18 = vld [vmem:[%s1412_s0 + $0x25] sm:$0x1]   ;;  %s880_s7 = smov 123   ;;  %s881_s8 = smov 117   ;;  %v65_v20 = vsel %vm5_vm0, %v697_v17, %v696_v16  ;;  %v700_v22 = vld [vmem:[%s1412_s0 + $0x24] sm:$0x1]  }
   0x6   :  { %v22_v9 = vsel %vm21_vm1, %v20_v5, %v14_v2  ;;  %v699_v19 = vld [vmem:[%s1412_s0 + $0x64] sm:$0x2]   ;;  %v701_v23 = vld [vmem:[%s1412_s0 + $0x63] sm:$0x2]   ;;  %v702_v24 = vld [vmem:[%s1412_s0 + $0x23] sm:$0x1]  }
   0x7   :  { %23 = vrot.lane.b32.xlu0 %v22_v9, %s878_s24  ;;  %v75_v21 = vsel %vm5_vm0, %v699_v19, %v698_v18  ;;  %v703_v25 = vld [vmem:[%s1412_s0 + $0x62] sm:$0x2]   ;;  %s882_s17 = smov 114   ;;  %s883_s18 = smov 111   ;;  %v85_v26 = vsel %vm5_vm0, %v701_v23, %v700_v22  ;;  %v704_v28 = vld [vmem:[%s1412_s0 + $0x22] sm:$0x1]  }
   0x8   :  { %56 = vrot.lane.b32.xlu1 %v55_v15, %s881_s8  ;;  %v95_v27 = vsel %vm5_vm0, %v703_v25, %v702_v24  ;;  %v705_v29 = vld [vmem:[%s1412_s0 + $0x61] sm:$0x2]   ;;  %v706_v30 = vld [vmem:[%s1412_s0 + $0x21] sm:$0x1]   ;;  %s884_s27 = smov 108   ;;  %s885_s28 = smov 105  }
   0x9   :  { %v707_v31 = vld [vmem:[%s1412_s0 + $0x60] sm:$0x2]   ;;  %v105_v32 = vsel %vm5_vm0, %v705_v29, %v704_v28  ;;  %v708_v34 = vld [vmem:[%s1412_s0 + $0x20] sm:$0x1]   ;;  %v710_v36 = vld [vmem:[%s1412_s0 + $0x1f] sm:$0x1]  }
   0xa   :  { %v115_v33 = vsel %vm5_vm0, %v707_v31, %v706_v30  ;;  %v709_v35 = vld [vmem:[%s1412_s0 + $0x5f] sm:$0x2]   ;;  %v711_v37 = vld [vmem:[%s1412_s0 + $0x5e] sm:$0x2]   ;;  %s886_s8 = smov 102   ;;  %s887_s9 = smov 99  }
   0xb   :  { %36 = vrot.lane.b32.xlu0 %v35_v14, %s880_s7  ;;  %v125_v38 = vsel %vm5_vm0, %v709_v35, %v708_v34  ;;  %v135_v39 = vsel %vm5_vm0, %v711_v37, %v710_v36  ;;  %v712_v40 = vld [vmem:[%s1412_s0 + $0x1e] sm:$0x1]   ;;  %v714_v42 = vld [vmem:[%s1412_s0 + $0x1d] sm:$0x1]   ;;  %s889_s19 = smov 93   ;;  %s891_s29 = smov 87  }
   0xc   :  { %76 = vrot.lane.b32.xlu1 %v75_v21, %s883_s18  ;;  %v713_v41 = vld [vmem:[%s1412_s0 + $0x5d] sm:$0x2]   ;;  %v715_v43 = vld [vmem:[%s1412_s0 + $0x5c] sm:$0x2]   ;;  %s888_s18 = smov 96   ;;  %s893_s10 = smov 81  }
   0xd   :  { %v145_v44 = vsel %vm5_vm0, %v713_v41, %v712_v40  ;;  %v155_v45 = vsel %vm5_vm0, %v715_v43, %v714_v42  ;;  %v716_v46 = vld [vmem:[%s1412_s0 + $0x1c] sm:$0x1]   ;;  %v718_v48 = vld [vmem:[%s1412_s0 + $0x1b] sm:$0x1]   ;;  %v720_v52 = vld [vmem:[%s1412_s0 + $0x1a] sm:$0x1]  }
   0xe   :  { %v717_v47 = vld [vmem:[%s1412_s0 + $0x5b] sm:$0x2]   ;;  %v719_v49 = vld [vmem:[%s1412_s0 + $0x5a] sm:$0x2]   ;;  %v721_v53 = vld [vmem:[%s1412_s0 + $0x59] sm:$0x2]  }
   0xf   :  { %66 = vrot.lane.b32.xlu0 %v65_v20, %s882_s17  ;;  %v165_v50 = vsel %vm5_vm0, %v717_v47, %v716_v46  ;;  %v175_v51 = vsel %vm5_vm0, %v719_v49, %v718_v48  ;;  %v722_v54 = vld [vmem:[%s1412_s0 + $0x19] sm:$0x1]   ;;  %v185_v56 = vsel %vm5_vm0, %v721_v53, %v720_v52  ;;  %v724_v58 = vld [vmem:[%s1412_s0 + $0x18] sm:$0x1]   ;;  %v726_v60 = vld [vmem:[%s1412_s0 + $0x17] sm:$0x1]  }
  0x10   :  { %96 = vrot.lane.b32.xlu1 %v95_v27, %s885_s28  ;;  %s890_s28 = smov 90   ;;  %v723_v55 = vld [vmem:[%s1412_s0 + $0x58] sm:$0x2]   ;;  %v725_v59 = vld [vmem:[%s1412_s0 + $0x57] sm:$0x2]   ;;  %s895_s20 = smov 75  }
  0x11   :  { %v195_v57 = vsel %vm5_vm0, %v723_v55, %v722_v54  ;;  %v727_v61 = vld [vmem:[%s1412_s0 + $0x56] sm:$0x2]   ;;  %v205_v62 = vsel %vm5_vm0, %v725_v59, %v724_v58  ;;  %v728_v0 = vld [vmem:[%s1412_s0 + $0x16] sm:$0x1]   ;;  %v730_v2 = vld [vmem:[%s1412_s0 + $0x15] sm:$0x1]  }
  0x12   :  { %v215_v63 = vsel %vm5_vm0, %v727_v61, %v726_v60  ;;  %v729_v1 = vld [vmem:[%s1412_s0 + $0x55] sm:$0x2]   ;;  %v731_v3 = vld [vmem:[%s1412_s0 + $0x54] sm:$0x2]   ;;  %s897_s30 = smov 69   ;;  %s899_s11 = smov 63  }
  0x13   :  { %86 = vrot.lane.b32.xlu0 %v85_v26, %s884_s27  ;;  %v225_v4 = vsel %vm5_vm0, %v729_v1, %v728_v0  ;;  %v235_v5 = vsel %vm5_vm0, %v731_v3, %v730_v2  ;;  %v732_v6 = vld [vmem:[%s1412_s0 + $0x3f] sm:$0x1]   ;;  %v734_v8 = vld [vmem:[%s1412_s0 + $0x14] sm:$0x1]   ;;  %v736_v12 = vld [vmem:[%s1412_s0 + $0x3e] sm:$0x1]  }
  0x14   :  { %116 = vrot.lane.b32.xlu1 %v115_v33, %s887_s9  ;;  %s892_s9 = smov 84   ;;  %v733_v7 = vld [vmem:[%s1412_s0 + $0x7e] sm:$0x2]   ;;  %v735_v9 = vld [vmem:[%s1412_s0 + $0x53] sm:$0x2]   ;;  %s901_s21 = smov 60  }
  0x15   :  { %v245_v10 = vsel %vm5_vm0, %v733_v7, %v732_v6  ;;  %v256_v11 = vsel %vm5_vm0, %v735_v9, %v734_v8  ;;  %v737_v13 = vld [vmem:[%s1412_s0 + $0x7d] sm:$0x2]   ;;  %v738_v14 = vld [vmem:[%s1412_s0 + $0x13] sm:$0x1]   ;;  %v740_v18 = vld [vmem:[%s1412_s0 + $0x3d] sm:$0x1]  }
  0x16   :  { %v739_v15 = vld [vmem:[%s1412_s0 + $0x52] sm:$0x2]   ;;  %v266_v16 = vsel %vm5_vm0, %v737_v13, %v736_v12  ;;  %v2_v19 = vld [vmem:[%s1412_s0] sm:$0x1]   ;;  %v741_v21 = vld [vmem:[%s1412_s0 + $0x7c] sm:$0x2]  }
  0x17   :  { %106 = vrot.lane.b32.xlu0 %v105_v32, %s886_s8  ;;  %v277_v17 = vsel %vm5_vm0, %v739_v15, %v738_v14  ;;  %v685_v20 = vld [vmem:[%s1412_s0 + $0x3f] sm:$0x2]   ;;  %v742_v22 = vld [vmem:[%s1412_s0 + $0x12] sm:$0x1]   ;;  %s902_s5 = smov 58   ;;  %s903_s6 = smov 57   ;;  %v287_v25 = vsel %vm5_vm0, %v741_v21, %v740_v18 }
  0x18   :  { %136 = vrot.lane.b32.xlu1 %v135_v39, %s889_s19  ;;  %s894_s19 = smov 78   ;;  %v743_v23 = vld [vmem:[%s1412_s0 + $0x51] sm:$0x2]   ;;  %v6_v24 = vsel %vm5_vm0, %v685_v20, %v2_v19  ;;  %v744_v27 = vld [vmem:[%s1412_s0 + $0x3c] sm:$0x1]   ;;  %s904_s15 = smov 55  }
  0x19   :  { %8 = vst.msk [vmem:[#allocation0] sm:$0x3] %vm7_vm2, %v6_v24   ;;  %v298_v26 = vsel %vm5_vm0, %v743_v23, %v742_v22  ;;  %v745_v28 = vld [vmem:[%s1412_s0 + $0x7b] sm:$0x2]   ;;  %v746_v29 = vld [vmem:[%s1412_s0 + $0x11] sm:$0x1]  }
  0x1a   :  { %v747_v30 = vld [vmem:[%s1412_s0 + $0x50] sm:$0x2]   ;;  %s905_s16 = smov 54   ;;  %v308_v31 = vsel %vm5_vm0, %v745_v28, %v744_v27  ;;  %v748_v33 = vld [vmem:[%s1412_s0 + $0x3b] sm:$0x1]   ;;  %s906_s25 = smov 52  }
  0x1b   :  { %126 = vrot.lane.b32.xlu0 %v125_v38, %s888_s18  ;;  %v319_v32 = vsel %vm5_vm0, %v747_v30, %v746_v29  ;;  %v749_v34 = vld [vmem:[%s1412_s0 + $0x7a] sm:$0x2]   ;;  %v750_v35 = vld [vmem:[%s1412_s0 + $0x10] sm:$0x1]   ;;  %s907_s26 = smov 51   ;;  %s909_s7 = smov 48  }
  0x1c   :  { %156 = vrot.lane.b32.xlu1 %v155_v45, %s891_s29  ;;  %s896_s29 = smov 72   ;;  %v751_v36 = vld [vmem:[%s1412_s0 + $0x4f] sm:$0x2]   ;;  %v329_v37 = vsel %vm5_vm0, %v749_v34, %v748_v33  ;;  %v752_v39 = vld [vmem:[%s1412_s0 + $0x3a] sm:$0x1]   ;;  %s911_s17 = smov 45  }
  0x1d   :  { %v340_v38 = vsel %vm5_vm0, %v751_v36, %v750_v35  ;;  %v753_v40 = vld [vmem:[%s1412_s0 + $0x79] sm:$0x2]   ;;  %v754_v41 = vld [vmem:[%s1412_s0 + $0xf] sm:$0x1]   ;;  %v756_v45 = vld [vmem:[%s1412_s0 + $0x39] sm:$0x1]  }
  0x1e   :  { %v755_v42 = vld [vmem:[%s1412_s0 + $0x4e] sm:$0x2]   ;;  %v350_v43 = vsel %vm5_vm0, %v753_v40, %v752_v39  ;;  %v757_v46 = vld [vmem:[%s1412_s0 + $0x78] sm:$0x2]   ;;  %v758_v47 = vld [vmem:[%s1412_s0 + $0xe] sm:$0x1]  }
  0x1f   :  { %146 = vrot.lane.b32.xlu0 %v145_v44, %s890_s28  ;;  %v361_v44 = vsel %vm5_vm0, %v755_v42, %v754_v41  ;;  %v759_v48 = vld [vmem:[%s1412_s0 + $0x4d] sm:$0x2]   ;;  %v371_v49 = vsel %vm5_vm0, %v757_v46, %v756_v45  ;;  %v761_v52 = vld [vmem:[%s1412_s0 + $0x77] sm:$0x2]   ;;  %v762_v53 = vld [vmem:[%s1412_s0 + $0xd] sm:$0x1]  }
  0x20   :  { %176 = vrot.lane.b32.xlu1 %v175_v51, %s893_s10  ;;  %s898_s10 = smov 66   ;;  %v760_v51 = vld [vmem:[%s1412_s0 + $0x38] sm:$0x1]   ;;  %v763_v54 = vld [vmem:[%s1412_s0 + $0x4c] sm:$0x2]   ;;  %s913_s27 = smov 42  }
  0x21   :  { %v392_v55 = vsel %vm5_vm0, %v761_v52, %v760_v51  ;;  %v765_v58 = vld [vmem:[%s1412_s0 + $0x76] sm:$0x2]   ;;  %v766_v59 = vld [vmem:[%s1412_s0 + $0xc] sm:$0x1]   ;;  %s915_s8 = smov 39   ;;  %s917_s18 = smov 36  }
  0x22   :  { %v767_v60 = vld [vmem:[%s1412_s0 + $0x4b] sm:$0x2]   ;;  %v769_v0 = vld [vmem:[%s1412_s0 + $0x75] sm:$0x2]   ;;  %v770_v1 = vld [vmem:[%s1412_s0 + $0xb] sm:$0x1]  }
  0x23   :  { %166 = vrot.lane.b32.xlu0 %v165_v50, %s892_s9  ;;  %v382_v50 = vsel %vm5_vm0, %v759_v48, %v758_v47  ;;  %v771_v2 = vld [vmem:[%s1412_s0 + $0x4a] sm:$0x2]   ;;  %v773_v6 = vld [vmem:[%s1412_s0 + $0x74] sm:$0x2]   ;;  %v774_v7 = vld [vmem:[%s1412_s0 + $0xa] sm:$0x1]  }
  0x24   :  { %196 = vrot.lane.b32.xlu1 %v195_v57, %s895_s20  ;;  %s900_s20 = smov 61   ;;  %v764_v57 = vld [vmem:[%s1412_s0 + $0x37] sm:$0x1]   ;;  %v775_v8 = vld [vmem:[%s1412_s0 + $0x49] sm:$0x2]   ;;  %s919_s28 = smov 33  }
  0x25   :  { %v413_v61 = vsel %vm5_vm0, %v765_v58, %v764_v57  ;;  %v777_v12 = vld [vmem:[%s1412_s0 + $0x73] sm:$0x2]   ;;  %v778_v13 = vld [vmem:[%s1412_s0 + $0x9] sm:$0x1]   ;;  %s921_s9 = smov 30   ;;  %vm28_vm4 = vcmask 1048560  }
  0x26   :  { %v779_v14 = vld [vmem:[%s1412_s0 + $0x48] sm:$0x2]   ;;  %v781_v18 = vld [vmem:[%s1412_s0 + $0x72] sm:$0x2]   ;;  %v782_v19 = vld [vmem:[%s1412_s0 + $0x8] sm:$0x1]  }
  0x27   :  { %186 = vrot.lane.b32.xlu0 %v185_v56, %s894_s19  ;;  %v403_v56 = vsel %vm5_vm0, %v763_v54, %v762_v53  ;;  %v783_v20 = vld [vmem:[%s1412_s0 + $0x47] sm:$0x2]   ;;  %s923_s19 = smov 27   ;;  %v784_v23 = vld [vmem:[%s1412_s0 + $0x32] sm:$0x1]   ;;  %vm38_vm5 = vcmask 1032152  }
  0x28   :  { %216 = vrot.lane.b32.xlu1 %v215_v63, %s897_s30  ;;  %v768_v63 = vld [vmem:[%s1412_s0 + $0x36] sm:$0x1]   ;;  %v508_v22 = vsel %vm5_vm0, %v783_v20, %v782_v19  ;;  %v785_v24 = vld [vmem:[%s1412_s0 + $0x71] sm:$0x2]   ;;  %v788_v29 = vld [vmem:[%s1412_s0 + $0x31] sm:$0x1]  }
  0x29   :  { %v434_v3 = vsel %vm5_vm0, %v769_v0, %v768_v63  ;;  %v518_v27 = vsel %vm5_vm0, %v785_v24, %v784_v23  ;;  %v789_v30 = vld [vmem:[%s1412_s0 + $0x70] sm:$0x2]   ;;  %v792_v35 = vld [vmem:[%s1412_s0 + $0x30] sm:$0x1]   ;;  %v796_v41 = vld [vmem:[%s1412_s0 + $0x2f] sm:$0x1]  }
  0x2a   :  { %v539_v33 = vsel %vm5_vm0, %v789_v30, %v788_v29  ;;  %v793_v36 = vld [vmem:[%s1412_s0 + $0x6f] sm:$0x2]   ;;  %v797_v42 = vld [vmem:[%s1412_s0 + $0x6e] sm:$0x2]   ;;  %s931_s30 = smov 15   ;;  %s937_s2 = smov 6  }
  0x2b   :  { %206 = vrot.lane.b32.xlu0 %v205_v62, %s896_s29  ;;  %v424_v62 = vsel %vm5_vm0, %v767_v60, %v766_v59  ;;  %s925_s29 = smov 24   ;;  %v560_v39 = vsel %vm5_vm0, %v793_v36, %v792_v35  ;;  %v581_v45 = vsel %vm5_vm0, %v797_v42, %v796_v41  ;;  %v800_v47 = vld [vmem:[%s1412_s0 + $0x2e] sm:$0x1]   ;;  %v804_v53 = vld [vmem:[%s1412_s0 + $0x2d] sm:$0x1]   ;;  %vm48_vm6 = vcmask 1007552  }
  0x2c   :  { %236 = vrot.lane.b32.xlu1 %v235_v5, %s899_s11  ;;  %v772_v5 = vld [vmem:[%s1412_s0 + $0x35] sm:$0x1]   ;;  %v801_v48 = vld [vmem:[%s1412_s0 + $0x6d] sm:$0x2]   ;;  %s933_s11 = smov 12   ;;  %vm58_vm7 = vcmask 982952  }
  0x2d   :  { %v455_v9 = vsel %vm5_vm0, %v773_v6, %v772_v5  ;;  %v602_v51 = vsel %vm5_vm0, %v801_v48, %v800_v47  ;;  %v805_v54 = vld [vmem:[%s1412_s0 + $0x6c] sm:$0x2]   ;;  %v808_v59 = vld [vmem:[%s1412_s0 + $0x2c] sm:$0x1]   ;;  %v810_v63 = vld [vmem:[%s1412_s0 + $0x1] sm:$0x1]  }
  0x2e   :  { %v623_v57 = vsel %vm5_vm0, %v805_v54, %v804_v53  ;;  %v811_v0 = vld [vmem:[%s1412_s0 + $0x40] sm:$0x2]   ;;  %v812_v5 = vld [vmem:[%s1412_s0 + $0x2b] sm:$0x1]   ;;  %vm68_vm8 = vcmask 958352   ;;  %vm78_vm9 = vcmask 933752  }
  0x2f   :  { %226 = vrot.lane.b32.xlu0 %v225_v4, %s898_s10  ;;  %v445_v4 = vsel %vm5_vm0, %v771_v2, %v770_v1  ;;  %s927_s10 = smov 21   ;;  %v655_v2 = vsel %vm5_vm0, %v811_v0, %v810_v63  ;;  %v813_v6 = vld [vmem:[%s1412_s0 + $0x6a] sm:$0x2]   ;;  %vm88_vm10 = vcmask 909152   ;;  %vm98_vm11 = vcmask 884552  }
  0x30   :  { %257 = vrot.lane.b32.xlu1 %v256_v11, %s901_s21  ;;  %v776_v11 = vld [vmem:[%s1412_s0 + $0x34] sm:$0x1]   ;;  %s935_s21 = smov 9   ;;  %vm108_vm12 = vcmask 859952   ;;  %vm118_vm13 = vcmask 835352   ;;  %vm128_vm14 = vcmask 810752  }
  0x31   :  { %v476_v15 = vsel %vm5_vm0, %v777_v12, %v776_v11  ;;  %vm138_vm15 = vcmask 786152   ;;  %vm158_vm1 = vcmask 736952   ;;  %vm168_vm2 = vcmask 712352  }
  0x33   :  { %246 = vrot.lane.b32.xlu0 %v245_v10, %s900_s20  ;;  %v466_v10 = vsel %vm5_vm0, %v775_v8, %v774_v7  ;;  %s929_s20 = smov 18   ;;  %v665_v7 = vsel %vm5_vm0, %v813_v6, %v812_v5 }
  0x34   :  { %278 = vrot.lane.b32.xlu1 %v277_v17, %s903_s6  ;;  %s908_s6 = smov 49   ;;  %v780_v17 = vld [vmem:[%s1412_s0 + $0x33] sm:$0x1]  }
  0x35   :  { %v497_v21 = vsel %vm5_vm0, %v781_v18, %v780_v17 }
  0x37   :  { %267 = vrot.lane.b32.xlu0 %v266_v16, %s902_s5  ;;  %v487_v16 = vsel %vm5_vm0, %v779_v14, %v778_v13 }
  0x38   :  { %299 = vrot.lane.b32.xlu1 %v298_v26, %s905_s16  ;;  %s910_s16 = smov 46   ;;  %v787_v26 = vld [vmem:[%s1412_s0 + $0x46] sm:$0x2]  }
  0x3b   :  { %288 = vrot.lane.b32.xlu0 %v287_v25, %s904_s15  ;;  %v786_v25 = vld [vmem:[%s1412_s0 + $0x7] sm:$0x1]  }
  0x3c   :  { %320 = vrot.lane.b32.xlu1 %v319_v32, %s907_s26  ;;  %s912_s26 = smov 43   ;;  %v529_v28 = vsel %vm5_vm0, %v787_v26, %v786_v25  ;;  %v791_v32 = vld [vmem:[%s1412_s0 + $0x45] sm:$0x2]  }
  0x3f   :  { %309 = vrot.lane.b32.xlu0 %v308_v31, %s906_s25  ;;  %v790_v31 = vld [vmem:[%s1412_s0 + $0x6] sm:$0x1]  }
  0x40   :  { %341 = vrot.lane.b32.xlu1 %v340_v38, %s909_s7  ;;  %s914_s7 = smov 40   ;;  %v550_v34 = vsel %vm5_vm0, %v791_v32, %v790_v31  ;;  %v795_v38 = vld [vmem:[%s1412_s0 + $0x44] sm:$0x2]  }
  0x43   :  { %330 = vrot.lane.b32.xlu0 %v329_v37, %s908_s6  ;;  %v794_v37 = vld [vmem:[%s1412_s0 + $0x5] sm:$0x1]  }
  0x44   :  { %362 = vrot.lane.b32.xlu1 %v361_v44, %s911_s17  ;;  %s916_s17 = smov 37   ;;  %v571_v40 = vsel %vm5_vm0, %v795_v38, %v794_v37  ;;  %v799_v44 = vld [vmem:[%s1412_s0 + $0x43] sm:$0x2]  }
  0x47   :  { %351 = vrot.lane.b32.xlu0 %v350_v43, %s910_s16  ;;  %v798_v43 = vld [vmem:[%s1412_s0 + $0x4] sm:$0x1]  }
  0x48   :  { %383 = vrot.lane.b32.xlu1 %v382_v50, %s913_s27  ;;  %s918_s27 = smov 34   ;;  %v592_v46 = vsel %vm5_vm0, %v799_v44, %v798_v43  ;;  %v803_v50 = vld [vmem:[%s1412_s0 + $0x42] sm:$0x2]  }
  0x4b   :  { %372 = vrot.lane.b32.xlu0 %v371_v49, %s912_s26  ;;  %v802_v49 = vld [vmem:[%s1412_s0 + $0x3] sm:$0x1]  }
  0x4c   :  { %404 = vrot.lane.b32.xlu1 %v403_v56, %s915_s8  ;;  %s920_s8 = smov 31   ;;  %v613_v52 = vsel %vm5_vm0, %v803_v50, %v802_v49  ;;  %v807_v56 = vld [vmem:[%s1412_s0 + $0x41] sm:$0x2]  }
  0x4f   :  { %393 = vrot.lane.b32.xlu0 %v392_v55, %s914_s7  ;;  %v806_v55 = vld [vmem:[%s1412_s0 + $0x2] sm:$0x1]   ;;  %s939_s7 = smov 3  }
  0x50   :  { %425 = vrot.lane.b32.xlu1 %v424_v62, %s917_s18  ;;  %s922_s18 = smov 28   ;;  %v634_v58 = vsel %vm5_vm0, %v807_v56, %v806_v55  ;;  %v809_v62 = vld [vmem:[%s1412_s0 + $0x6b] sm:$0x2]   ;;  %s938_s0 = smov 4  }
  0x51   :  { %v644_v1 = vsel %vm5_vm0, %v809_v62, %v808_v59  ;;  %vm148_vm0 = vcmask 761552  }
  0x53   :  { %414 = vrot.lane.b32.xlu0 %v413_v61, %s916_s17 }
  0x54   :  { %446 = vrot.lane.b32.xlu1 %v445_v4, %s919_s28  ;;  %s924_s28 = smov 25  }
  0x57   :  { %435 = vrot.lane.b32.xlu0 %v434_v3, %s918_s27 }
  0x58   :  { %467 = vrot.lane.b32.xlu1 %v466_v10, %s921_s9  ;;  %s926_s9 = smov 22  }
  0x5b   :  { %456 = vrot.lane.b32.xlu0 %v455_v9, %s920_s8  ;;  %s940_s8 = smov 1  }
  0x5c   :  { %488 = vrot.lane.b32.xlu1 %v487_v16, %s923_s19  ;;  %s928_s19 = smov 19  }
  0x5f   :  { %477 = vrot.lane.b32.xlu0 %v476_v15, %s922_s18 }
  0x60   :  { %509 = vrot.lane.b32.xlu1 %v508_v22, %s925_s29  ;;  %s930_s29 = smov 16  }
  0x63   :  { %498 = vrot.lane.b32.xlu0 %v497_v21, %s924_s28 }
  0x64   :  { %530 = vrot.lane.b32.xlu1 %v529_v28, %s927_s10  ;;  %s932_s10 = smov 13  }
  0x67   :  { %519 = vrot.lane.b32.xlu0 %v518_v27, %s926_s9 }
  0x68   :  { %551 = vrot.lane.b32.xlu1 %v550_v34, %s929_s20  ;;  %s934_s20 = smov 10  }
  0x6b   :  { %540 = vrot.lane.b32.xlu0 %v539_v33, %s928_s19 }
  0x6c   :  { %572 = vrot.lane.b32.xlu1 %v571_v40, %s931_s30  ;;  %s936_s30 = smov 7  }
  0x6f   :  { %561 = vrot.lane.b32.xlu0 %v560_v39, %s930_s29 }
  0x70   :  { %593 = vrot.lane.b32.xlu1 %v592_v46, %s933_s11 }
  0x73   :  { %582 = vrot.lane.b32.xlu0 %v581_v45, %s932_s10 }
  0x74   :  { %614 = vrot.lane.b32.xlu1 %v613_v52, %s935_s21 }
  0x76   :  { %v47_v61 = vpop.permute.xlu1 %46  }
  0x77   :  { %603 = vrot.lane.b32.xlu0 %v602_v51, %s934_s20 }
  0x78   :  { %635 = vrot.lane.b32.xlu1 %v634_v58, %s937_s2 }
  0x79   :  { %v24_v60 = vpop.permute.xlu0 %23  }
  0x7a   :  { %27 = vst.msk [vmem:[#allocation0 + $0x8] sm:$0x3] %vm25_vm3, %v24_v60   ;;  %v57_v4 = vpop.permute.xlu1 %56   ;;  %vm178_vm3 = vcmask 687752  }
  0x7b   :  { %29 = vst.msk [vmem:[#allocation0] sm:$0x3] %vm28_vm4, %v24_v60   ;;  %624 = vrot.lane.b32.xlu0 %v623_v57, %s936_s30  ;;  %vm188_vm4 = vcmask 663152  }
  0x7c   :  { %656 = vrot.lane.b32.xlu1 %v655_v2, %s939_s7 }
  0x7d   :  { %v37_v3 = vpop.permute.xlu0 %36  }
  0x7e   :  { %39 = vst.msk [vmem:[#allocation0] sm:$0x3] %vm38_vm5, %v37_v3   ;;  %v77_v9 = vpop.permute.xlu1 %76   ;;  %vm198_vm5 = vcmask 638552  }
  0x7f   :  { %49 = vst.msk [vmem:[#allocation0] sm:$0x3] %vm48_vm6, %v47_v61   ;;  %645 = vrot.lane.b32.xlu0 %v644_v1, %s938_s0  ;;  %vm208_vm6 = vcmask 613952  }
  0x80   :  { %59 = vst.msk [vmem:[#allocation0] sm:$0x3] %vm58_vm7, %v57_v4   ;;  %vm218_vm7 = vcmask 589352  }
  0x81   :  { %v67_v8 = vpop.permute.xlu0 %66  }
  0x82   :  { %69 = vst.msk [vmem:[#allocation0] sm:$0x3] %vm68_vm8, %v67_v8   ;;  %v97_v11 = vpop.permute.xlu1 %96   ;;  %vm228_vm8 = vcmask 564752  }
  0x83   :  { %666 = vrot.lane.b32.xlu0 %v665_v7, %s940_s8  ;;  %79 = vst.msk [vmem:[#allocation0] sm:$0x3] %vm78_vm9, %v77_v9   ;;  %vm238_vm9 = vcmask 540152  }
  0x85   :  { %v87_v10 = vpop.permute.xlu0 %86  }
  0x86   :  { %89 = vst.msk [vmem:[#allocation0] sm:$0x3] %vm88_vm10, %v87_v10   ;;  %v117_v13 = vpop.permute.xlu1 %116   ;;  %vm248_vm10 = vcmask 523752  }
  0x87   :  { %99 = vst.msk [vmem:[#allocation0] sm:$0x3] %vm98_vm11, %v97_v11   ;;  %vm259_vm11 = vcmask 515552  }
  0x89   :  { %v107_v12 = vpop.permute.xlu0 %106  }
  0x8a   :  { %109 = vst.msk [vmem:[#allocation0] sm:$0x3] %vm108_vm12, %v107_v12   ;;  %v137_v15 = vpop.permute.xlu1 %136   ;;  %vm269_vm12 = vcmask 499152  }
  0x8b   :  { %119 = vst.msk [vmem:[#allocation0] sm:$0x3] %vm118_vm13, %v117_v13   ;;  %vm280_vm13 = vcmask 490952  }
  0x8d   :  { %v127_v14 = vpop.permute.xlu0 %126  }
  0x8e   :  { %129 = vst.msk [vmem:[#allocation0] sm:$0x3] %vm128_vm14, %v127_v14   ;;  %v157_v17 = vpop.permute.xlu1 %156   ;;  %vm290_vm14 = vcmask 474552  }
  0x8f   :  { %139 = vst.msk [vmem:[#allocation0] sm:$0x3] %vm138_vm15, %v137_v15   ;;  %vm301_vm15 = vcmask 466352  }
  0x91   :  { %v147_v16 = vpop.permute.xlu0 %146  }
  0x92   :  { %149 = vst.msk [vmem:[#allocation0] sm:$0x3] %vm148_vm0, %v147_v16   ;;  %v177_v19 = vpop.permute.xlu1 %176   ;;  %vm311_vm0 = vcmask 449952  }
  0x93   :  { %159 = vst.msk [vmem:[#allocation0] sm:$0x3] %vm158_vm1, %v157_v17   ;;  %vm322_vm1 = vcmask 441752  }
  0x95   :  { %v167_v18 = vpop.permute.xlu0 %166  }
  0x96   :  { %169 = vst.msk [vmem:[#allocation0] sm:$0x3] %vm168_vm2, %v167_v18   ;;  %v197_v21 = vpop.permute.xlu1 %196   ;;  %vm332_vm2 = vcmask 425352  }
  0x97   :  { %179 = vst.msk [vmem:[#allocation0] sm:$0x3] %vm178_vm3, %v177_v19   ;;  %vm343_vm3 = vcmask 417152  }
  0x99   :  { %v187_v20 = vpop.permute.xlu0 %186  }
  0x9a   :  { %189 = vst.msk [vmem:[#allocation0] sm:$0x3] %vm188_vm4, %v187_v20   ;;  %v217_v23 = vpop.permute.xlu1 %216   ;;  %vm353_vm4 = vcmask 400752  }
  0x9b   :  { %199 = vst.msk [vmem:[#allocation0] sm:$0x3] %vm198_vm5, %v197_v21   ;;  %vm364_vm5 = vcmask 392552  }
  0x9d   :  { %v207_v22 = vpop.permute.xlu0 %206  }
  0x9e   :  { %209 = vst.msk [vmem:[#allocation0] sm:$0x3] %vm208_vm6, %v207_v22   ;;  %v237_v25 = vpop.permute.xlu1 %236   ;;  %vm374_vm6 = vcmask 376152  }
  0x9f   :  { %219 = vst.msk [vmem:[#allocation0] sm:$0x3] %vm218_vm7, %v217_v23   ;;  %vm385_vm7 = vcmask 367952  }
  0xa1   :  { %v227_v24 = vpop.permute.xlu0 %226  }
  0xa2   :  { %229 = vst.msk [vmem:[#allocation0] sm:$0x3] %vm228_vm8, %v227_v24   ;;  %v258_v27 = vpop.permute.xlu1 %257   ;;  %vm395_vm8 = vcmask 351552  }
  0xa3   :  { %239 = vst.msk [vmem:[#allocation0] sm:$0x3] %vm238_vm9, %v237_v25   ;;  %vm406_vm9 = vcmask 343352  }
  0xa4   :  { %260 = vst.msk [vmem:[#allocation0] sm:$0x3] %vm259_vm11, %v258_v27   ;;  %vm427_vm11 = vcmask 318752  }
  0xa5   :  { %v247_v26 = vpop.permute.xlu0 %246  }
  0xa6   :  { %250 = vst.msk [vmem:[#allocation0 + $0x8] sm:$0x3] %vm248_vm10, %v247_v26   ;;  %v279_v29 = vpop.permute.xlu1 %278   ;;  %vm416_vm10 = vcmask 326952  }
  0xa7   :  { %281 = vst.msk [vmem:[#allocation0] sm:$0x3] %vm280_vm13, %v279_v29   ;;  %vm448_vm13 = vcmask 294152  }
  0xa9   :  { %v268_v28 = vpop.permute.xlu0 %267  }
  0xaa   :  { %271 = vst.msk [vmem:[#allocation0 + $0x8] sm:$0x3] %vm269_vm12, %v268_v28   ;;  %v300_v31 = vpop.permute.xlu1 %299   ;;  %vm437_vm12 = vcmask 302352  }
  0xab   :  { %302 = vst.msk [vmem:[#allocation0] sm:$0x3] %vm301_vm15, %v300_v31   ;;  %vm469_vm15 = vcmask 269552  }
  0xad   :  { %v289_v30 = vpop.permute.xlu0 %288  }
  0xae   :  { %292 = vst.msk [vmem:[#allocation0 + $0x8] sm:$0x3] %vm290_vm14, %v289_v30   ;;  %v321_v33 = vpop.permute.xlu1 %320   ;;  %vm458_vm14 = vcmask 277752  }
  0xaf   :  { %323 = vst.msk [vmem:[#allocation0] sm:$0x3] %vm322_vm1, %v321_v33   ;;  %vm490_vm1 = vcmask 244952  }
  0xb1   :  { %v310_v32 = vpop.permute.xlu0 %309  }
  0xb2   :  { %313 = vst.msk [vmem:[#allocation0 + $0x8] sm:$0x3] %vm311_vm0, %v310_v32   ;;  %v342_v35 = vpop.permute.xlu1 %341   ;;  %vm479_vm0 = vcmask 253152  }
  0xb3   :  { %344 = vst.msk [vmem:[#allocation0] sm:$0x3] %vm343_vm3, %v342_v35   ;;  %vm511_vm3 = vcmask 220352  }
  0xb5   :  { %v331_v34 = vpop.permute.xlu0 %330  }
  0xb6   :  { %334 = vst.msk [vmem:[#allocation0 + $0x8] sm:$0x3] %vm332_vm2, %v331_v34   ;;  %v363_v37 = vpop.permute.xlu1 %362   ;;  %vm500_vm2 = vcmask 228552  }
  0xb7   :  { %365 = vst.msk [vmem:[#allocation0] sm:$0x3] %vm364_vm5, %v363_v37   ;;  %vm532_vm5 = vcmask 195752  }
  0xb9   :  { %v352_v36 = vpop.permute.xlu0 %351  }
  0xba   :  { %355 = vst.msk [vmem:[#allocation0 + $0x8] sm:$0x3] %vm353_vm4, %v352_v36   ;;  %v384_v39 = vpop.permute.xlu1 %383   ;;  %vm521_vm4 = vcmask 203952  }
  0xbb   :  { %386 = vst.msk [vmem:[#allocation0] sm:$0x3] %vm385_vm7, %v384_v39   ;;  %vm553_vm7 = vcmask 171152  }
  0xbd   :  { %v373_v38 = vpop.permute.xlu0 %372  }
  0xbe   :  { %376 = vst.msk [vmem:[#allocation0 + $0x8] sm:$0x3] %vm374_vm6, %v373_v38   ;;  %v405_v41 = vpop.permute.xlu1 %404   ;;  %vm542_vm6 = vcmask 179352  }
  0xbf   :  { %407 = vst.msk [vmem:[#allocation0] sm:$0x3] %vm406_vm9, %v405_v41   ;;  %vm574_vm9 = vcmask 146552  }
  0xc1   :  { %v394_v40 = vpop.permute.xlu0 %393  }
  0xc2   :  { %397 = vst.msk [vmem:[#allocation0 + $0x8] sm:$0x3] %vm395_vm8, %v394_v40   ;;  %v426_v43 = vpop.permute.xlu1 %425   ;;  %vm563_vm8 = vcmask 154752  }
  0xc3   :  { %428 = vst.msk [vmem:[#allocation0] sm:$0x3] %vm427_vm11, %v426_v43   ;;  %vm595_vm11 = vcmask 121952  }
  0xc5   :  { %v415_v42 = vpop.permute.xlu0 %414  }
  0xc6   :  { %418 = vst.msk [vmem:[#allocation0 + $0x8] sm:$0x3] %vm416_vm10, %v415_v42   ;;  %v447_v45 = vpop.permute.xlu1 %446   ;;  %vm584_vm10 = vcmask 130152  }
  0xc7   :  { %449 = vst.msk [vmem:[#allocation0] sm:$0x3] %vm448_vm13, %v447_v45   ;;  %vm616_vm13 = vcmask 97352  }
  0xc9   :  { %v436_v44 = vpop.permute.xlu0 %435  }
  0xca   :  { %439 = vst.msk [vmem:[#allocation0 + $0x8] sm:$0x3] %vm437_vm12, %v436_v44   ;;  %v468_v47 = vpop.permute.xlu1 %467   ;;  %vm605_vm12 = vcmask 105552  }
  0xcb   :  { %470 = vst.msk [vmem:[#allocation0] sm:$0x3] %vm469_vm15, %v468_v47   ;;  %vm637_vm15 = vcmask 72752  }
  0xcd   :  { %v457_v46 = vpop.permute.xlu0 %456  }
  0xce   :  { %460 = vst.msk [vmem:[#allocation0 + $0x8] sm:$0x3] %vm458_vm14, %v457_v46   ;;  %v489_v49 = vpop.permute.xlu1 %488   ;;  %vm626_vm14 = vcmask 80952  }
  0xcf   :  { %491 = vst.msk [vmem:[#allocation0] sm:$0x3] %vm490_vm1, %v489_v49   ;;  %vm658_vm1 = vcmask 48152  }
  0xd1   :  { %v478_v48 = vpop.permute.xlu0 %477  }
  0xd2   :  { %481 = vst.msk [vmem:[#allocation0 + $0x8] sm:$0x3] %vm479_vm0, %v478_v48   ;;  %v510_v51 = vpop.permute.xlu1 %509   ;;  %vm647_vm0 = vcmask 56352  }
  0xd3   :  { %512 = vst.msk [vmem:[#allocation0] sm:$0x3] %vm511_vm3, %v510_v51  }
  0xd5   :  { %v499_v50 = vpop.permute.xlu0 %498  }
  0xd6   :  { %502 = vst.msk [vmem:[#allocation0 + $0x8] sm:$0x3] %vm500_vm2, %v499_v50   ;;  %v531_v53 = vpop.permute.xlu1 %530   ;;  %vm668_vm2 = vcmask 31752  }
  0xd7   :  { %533 = vst.msk [vmem:[#allocation0] sm:$0x3] %vm532_vm5, %v531_v53  }
  0xd9   :  { %v520_v52 = vpop.permute.xlu0 %519  }
  0xda   :  { %523 = vst.msk [vmem:[#allocation0 + $0x8] sm:$0x3] %vm521_vm4, %v520_v52   ;;  %v552_v55 = vpop.permute.xlu1 %551  }
  0xdb   :  { %554 = vst.msk [vmem:[#allocation0] sm:$0x3] %vm553_vm7, %v552_v55  }
  0xdd   :  { %v541_v54 = vpop.permute.xlu0 %540  }
  0xde   :  { %544 = vst.msk [vmem:[#allocation0 + $0x8] sm:$0x3] %vm542_vm6, %v541_v54   ;;  %v573_v57 = vpop.permute.xlu1 %572  }
  0xdf   :  { %575 = vst.msk [vmem:[#allocation0] sm:$0x3] %vm574_vm9, %v573_v57  }
  0xe1   :  { %v562_v56 = vpop.permute.xlu0 %561  }
  0xe2   :  { %565 = vst.msk [vmem:[#allocation0 + $0x8] sm:$0x3] %vm563_vm8, %v562_v56   ;;  %v594_v59 = vpop.permute.xlu1 %593  }
  0xe3   :  { %596 = vst.msk [vmem:[#allocation0] sm:$0x3] %vm595_vm11, %v594_v59  }
  0xe5   :  { %v583_v58 = vpop.permute.xlu0 %582  }
  0xe6   :  { %586 = vst.msk [vmem:[#allocation0 + $0x8] sm:$0x3] %vm584_vm10, %v583_v58   ;;  %v615_v61 = vpop.permute.xlu1 %614  }
  0xe7   :  { %617 = vst.msk [vmem:[#allocation0] sm:$0x3] %vm616_vm13, %v615_v61  }
  0xe9   :  { %v604_v60 = vpop.permute.xlu0 %603  }
  0xea   :  { %607 = vst.msk [vmem:[#allocation0 + $0x8] sm:$0x3] %vm605_vm12, %v604_v60   ;;  %v636_v63 = vpop.permute.xlu1 %635  }
  0xeb   :  { %638 = vst.msk [vmem:[#allocation0] sm:$0x3] %vm637_vm15, %v636_v63  }
  0xed   :  { %v625_v62 = vpop.permute.xlu0 %624  }
  0xee   :  { %628 = vst.msk [vmem:[#allocation0 + $0x8] sm:$0x3] %vm626_vm14, %v625_v62   ;;  %v657_v1 = vpop.permute.xlu1 %656  }
  0xef   :  { %659 = vst.msk [vmem:[#allocation0] sm:$0x3] %vm658_vm1, %v657_v1  }
  0xf1   :  { %v646_v0 = vpop.permute.xlu0 %645  }
  0xf2   :  { %649 = vst.msk [vmem:[#allocation0 + $0x8] sm:$0x3] %vm647_vm0, %v646_v0  }
  0xf5   :  { %v667_v2 = vpop.permute.xlu0 %666  }
  0xf6   :  { %670 = vst.msk [vmem:[#allocation0 + $0x8] sm:$0x3] %vm668_vm2, %v667_v2   ;;  %v675_v3 = vld [vmem:[#allocation0] sm:$0x3] }
  0xf7   :  { %678 = vst [vmem:[%s1413_s1] sm:$0x3] %v675_v3 }
  0xfd   :  { %v680_v4 = vld [vmem:[#allocation0 + $0x8] sm:$0x3] }
  0xfe   :  { %814 = vst [vmem:[%s1413_s1 + $0x2] sm:$0x3] %v680_v4 }

// kernel: faster_rcnn_forward.8
= control target key start
LH: loop header
LB: loop body
LE: loop exit
PB: predicated region body
PF: predicated region fallthrough
CT: control target
= control target key end

     0   :  { %s586_s1 = inlined_call_operand.vmem [shape: bf16[128,128], index: 1, kind: input, shape index: {}]   ;;  %s587_s0 = inlined_call_operand.vmem [shape: bf16[128,128], index: 0, kind: input, shape index: {}]   ;;  %s588_s2 = inlined_call_operand.vmem [shape: f32[1,128], index: 2, kind: input, shape index: {}]   ;;  %s589_s3 = inlined_call_operand.vmem [shape: f32[128,128], index: 3, kind: output, shape index: {}]  }
   0x1   :  { %v451_v0 = vld [vmem:[%s586_s1 + $0x38] sm:$0xff]   ;;  %v452_v1 = vld [vmem:[%s586_s1 + $0x30] sm:$0xff]   ;;  %v453_v2 = vld [vmem:[%s586_s1 + $0x28] sm:$0xff]  }
   0x2   :  { %403 = vmatprep.subr.bf16.mxu0 %v451_v0  ;;  %435 = vmatprep.subr.bf16.mxu1 %v451_v0  ;;  %v454_v3 = vld [vmem:[%s586_s1 + $0x20] sm:$0xff]   ;;  %v455_v6 = vld [vmem:[%s586_s1 + $0x18] sm:$0xff]   ;;  %v456_v7 = vld [vmem:[%s586_s1 + $0x10] sm:$0xff]  }
   0x3   :  { %404 = vmatpush3.bf16.msra.mxu0 %v451_v0  ;;  %443 = vmatpush3.bf16.msra.mxu1 %v451_v0  ;;  %v459_v4 = vld [vmem:[%s587_s0] sm:$0xff]   ;;  %v457_v8 = vld [vmem:[%s586_s1 + $0x8] sm:$0xff]   ;;  %v463_v12 = vld [vmem:[%s587_s0 + $0x10] sm:$0xff]  }
   0x4   :  { %405 = vmatprep.subr.bf16.mxu0 %v452_v1  ;;  %436 = vmatprep.subr.bf16.mxu1 %v452_v1  ;;  %v460_v5 = vld [vmem:[%s587_s0 + $0x20] sm:$0xff]   ;;  %v461_v10 = vld [vmem:[%s587_s0 + $0x8] sm:$0xff]   ;;  %v464_v13 = vld [vmem:[%s587_s0 + $0x30] sm:$0xff]  }
   0x5   :  { %419 = vmatprep.mubr.bf16.mxu0 %v459_v4  ;;  %427 = vmatprep.mubr.bf16.mxu1 %v460_v5  ;;  %v458_v9 = vld [vmem:[%s586_s1] sm:$0xff]   ;;  %v462_v11 = vld [vmem:[%s587_s0 + $0x28] sm:$0xff]   ;;  %v465_v14 = vld [vmem:[%s587_s0 + $0x18] sm:$0xff]  }
   0x6   :  { %v466_v15 = vld [vmem:[%s587_s0 + $0x38] sm:$0xff]   ;;  %v386_v16 = vld [vmem:[%s588_s2] ss:$0 sm:$0xff] }
   0x7   :  { %406 = vmatpush3.bf16.msra.mxu0 %v452_v1  ;;  %444 = vmatpush3.bf16.msra.mxu1 %v452_v1 }
   0x8   :  { %407 = vmatprep.subr.bf16.mxu0 %v453_v2  ;;  %437 = vmatprep.subr.bf16.mxu1 %v453_v2 }
   0xb   :  { %408 = vmatpush3.bf16.msra.mxu0 %v453_v2  ;;  %445 = vmatpush3.bf16.msra.mxu1 %v453_v2 }
   0xc   :  { %409 = vmatprep.subr.bf16.mxu0 %v454_v3  ;;  %438 = vmatprep.subr.bf16.mxu1 %v454_v3 }
   0xf   :  { %410 = vmatpush3.bf16.msra.mxu0 %v454_v3  ;;  %446 = vmatpush3.bf16.msra.mxu1 %v454_v3 }
  0x10   :  { %411 = vmatprep.subr.bf16.mxu0 %v455_v6  ;;  %439 = vmatprep.subr.bf16.mxu1 %v455_v6 }
  0x13   :  { %412 = vmatpush3.bf16.msra.mxu0 %v455_v6  ;;  %447 = vmatpush3.bf16.msra.mxu1 %v455_v6 }
  0x14   :  { %413 = vmatprep.subr.bf16.mxu0 %v456_v7  ;;  %440 = vmatprep.subr.bf16.mxu1 %v456_v7 }
  0x17   :  { %414 = vmatpush3.bf16.msra.mxu0 %v456_v7  ;;  %448 = vmatpush3.bf16.msra.mxu1 %v456_v7 }
  0x18   :  { %415 = vmatprep.subr.bf16.mxu0 %v457_v8  ;;  %441 = vmatprep.subr.bf16.mxu1 %v457_v8 }
  0x1b   :  { %416 = vmatpush3.bf16.msra.mxu0 %v457_v8  ;;  %449 = vmatpush3.bf16.msra.mxu1 %v457_v8 }
  0x1c   :  { %417 = vmatprep.subr.bf16.mxu0 %v458_v9  ;;  %442 = vmatprep.subr.bf16.mxu1 %v458_v9 }
  0x1f   :  { %418 = vmatpush3.bf16.msra.mxu0 %v458_v9  ;;  %450 = vmatpush3.bf16.msra.mxu1 %v458_v9 }
  0x22   :  { %420 = vmatmul.mubr.bf16.vlgmr.msra.gmra.mxu0 %v461_v10  ;;  %428 = vmatmul.mubr.bf16.vlgmr.msra.gmra.mxu1 %v462_v11 }
  0x23   :  { %423 = vmatprep.mubr.bf16.mxu0 %v463_v12  ;;  %431 = vmatprep.mubr.bf16.mxu1 %v464_v13 }
  0x2a   :  { %424 = vmatmul.mubr.bf16.gmra.mxu0 %v465_v14  ;;  %432 = vmatmul.mubr.bf16.gmra.mxu1 %v466_v15 }
  0xe2   :  { %v421_v17 = vpop.f32.mrf.mxu0  ;;  %v429_v18 = vpop.f32.mrf.mxu1 }
  0xe3   :  { %v336_v19 = vadd.f32 %v421_v17, %v386_v16  ;;  %v344_v20 = vadd.f32 %v429_v18, %v386_v16 }
  0xe4   :  { %v213_v21 = vpop.f32.mrf.mxu0  ;;  %v245_v22 = vpop.f32.mrf.mxu1 }
  0xe5   :  { %352 = vst [vmem:[%s589_s3 + $0x10] sm:$0xff] %v336_v19  ;;  %360 = vst [vmem:[%s589_s3 + $0x50] sm:$0xff] %v344_v20  ;;  %v334_v23 = vadd.f32 %v386_v16, %v213_v21  ;;  %v342_v24 = vadd.f32 %v386_v16, %v245_v22 }
  0xe6   :  { %v422_v25 = vpop.f32.mrf.mxu0  ;;  %v430_v26 = vpop.f32.mrf.mxu1 }
  0xe7   :  { %350 = vst [vmem:[%s589_s3] sm:$0xff] %v334_v23  ;;  %358 = vst [vmem:[%s589_s3 + $0x40] sm:$0xff] %v342_v24  ;;  %v337_v27 = vadd.f32 %v422_v25, %v386_v16  ;;  %v345_v28 = vadd.f32 %v430_v26, %v386_v16 }
  0xe8   :  { %v216_v29 = vpop.f32.mrf.mxu0  ;;  %v248_v30 = vpop.f32.mrf.mxu1 }
  0xe9   :  { %353 = vst [vmem:[%s589_s3 + $0x18] sm:$0xff] %v337_v27  ;;  %361 = vst [vmem:[%s589_s3 + $0x58] sm:$0xff] %v345_v28  ;;  %v335_v31 = vadd.f32 %v386_v16, %v216_v29  ;;  %v343_v32 = vadd.f32 %v386_v16, %v248_v30 }
  0xea   :  { %v425_v33 = vpop.f32.mrf.mxu0  ;;  %v433_v34 = vpop.f32.mrf.mxu1 }
  0xeb   :  { %351 = vst [vmem:[%s589_s3 + $0x8] sm:$0xff] %v335_v31  ;;  %359 = vst [vmem:[%s589_s3 + $0x48] sm:$0xff] %v343_v32  ;;  %v340_v35 = vadd.f32 %v425_v33, %v386_v16  ;;  %v348_v36 = vadd.f32 %v433_v34, %v386_v16 }
  0xec   :  { %v229_v37 = vpop.f32.mrf.mxu0  ;;  %v261_v38 = vpop.f32.mrf.mxu1 }
  0xed   :  { %356 = vst [vmem:[%s589_s3 + $0x30] sm:$0xff] %v340_v35  ;;  %364 = vst [vmem:[%s589_s3 + $0x70] sm:$0xff] %v348_v36  ;;  %v338_v39 = vadd.f32 %v386_v16, %v229_v37  ;;  %v346_v40 = vadd.f32 %v386_v16, %v261_v38 }
  0xee   :  { %v426_v41 = vpop.f32.mrf.mxu0  ;;  %v434_v42 = vpop.f32.mrf.mxu1 }
  0xef   :  { %354 = vst [vmem:[%s589_s3 + $0x20] sm:$0xff] %v338_v39  ;;  %362 = vst [vmem:[%s589_s3 + $0x60] sm:$0xff] %v346_v40  ;;  %v341_v43 = vadd.f32 %v426_v41, %v386_v16  ;;  %v349_v44 = vadd.f32 %v434_v42, %v386_v16 }
  0xf0   :  { %v232_v45 = vpop.f32.mrf.mxu0  ;;  %v264_v46 = vpop.f32.mrf.mxu1 }
  0xf1   :  { %357 = vst [vmem:[%s589_s3 + $0x38] sm:$0xff] %v341_v43  ;;  %365 = vst [vmem:[%s589_s3 + $0x78] sm:$0xff] %v349_v44  ;;  %v339_v47 = vadd.f32 %v386_v16, %v232_v45  ;;  %v347_v48 = vadd.f32 %v386_v16, %v264_v46 }
  0xf3   :  { %355 = vst [vmem:[%s589_s3 + $0x28] sm:$0xff] %v339_v47  ;;  %363 = vst [vmem:[%s589_s3 + $0x68] sm:$0xff] %v347_v48 }

// kernel: faster_rcnn_forward.9
= control target key start
LH: loop header
LB: loop body
LE: loop exit
PB: predicated region body
PF: predicated region fallthrough
CT: control target
= control target key end

     0   :  { %v845_v34 = vmov 0.0   ;;  %vm846_vm0 = vmmov 0   ;;  %s1076_s1 = inlined_call_operand.vmem [shape: bf16[512,128], index: 1, kind: input, shape index: {}]   ;;  %s1077_s0 = inlined_call_operand.vmem [shape: bf16[16,512], index: 0, kind: input, shape index: {}]   ;;  %s1078_s3 = inlined_call_operand.vmem [shape: bf16[128,128], index: 3, kind: input, shape index: {}]   ;;  %s1079_s5 = inlined_call_operand.vmem [shape: bf16[128,128], index: 5, kind: input, shape index: {}]   ;;  %s1080_s2 = inlined_call_operand.vmem [shape: f32[1,128], index: 2, kind: input, shape index: {}]   ;;  %s1081_s4 = inlined_call_operand.vmem [shape: f32[1,128], index: 4, kind: input, shape index: {}]   ;;  %s1082_s6 = inlined_call_operand.vmem [shape: f32[1,128], index: 6, kind: input, shape index: {}]   ;;  %s1083_s7 = inlined_call_operand.vmem [shape: f32[16,128], index: 7, kind: output, shape index: {}]  }
   0x1   :  { %v791_v0 = vld [vmem:[%s1076_s1 + $0x78] sm:$0xff]   ;;  %v795_v4 = vld [vmem:[%s1076_s1 + $0x70] sm:$0xff]   ;;  %v799_v8 = vld [vmem:[%s1076_s1 + $0x68] sm:$0xff]  }
   0x2   :  { %v792_v1 = vld [vmem:[%s1076_s1 + $0xf8] sm:$0xff]   ;;  %687 = vmatprep.subr.bf16.mxu0 %v791_v0  ;;  %v796_v5 = vld [vmem:[%s1076_s1 + $0xf0] sm:$0xff]   ;;  %v800_v9 = vld [vmem:[%s1076_s1 + $0xe8] sm:$0xff]  }
   0x3   :  { %v793_v2 = vld [vmem:[%s1076_s1 + $0x38] sm:$0xff]   ;;  %709 = vmatprep.subr.bf16.mxu1 %v792_v1  ;;  %v797_v6 = vld [vmem:[%s1076_s1 + $0x30] sm:$0xff]   ;;  %v801_v10 = vld [vmem:[%s1076_s1 + $0x28] sm:$0xff]  }
   0x4   :  { %v794_v3 = vld [vmem:[%s1076_s1 + $0xb8] sm:$0xff]   ;;  %688 = vmatpush3.bf16.msra.mxu0 %v793_v2  ;;  %v798_v7 = vld [vmem:[%s1076_s1 + $0xb0] sm:$0xff]   ;;  %v802_v11 = vld [vmem:[%s1076_s1 + $0xa8] sm:$0xff]  }
   0x5   :  { %710 = vmatpush3.bf16.msra.mxu1 %v794_v3  ;;  %689 = vmatprep.subr.bf16.mxu0 %v795_v4  ;;  %v803_v12 = vld [vmem:[%s1076_s1 + $0x60] sm:$0xff]   ;;  %v807_v16 = vld [vmem:[%s1076_s1 + $0x58] sm:$0xff]   ;;  %v811_v20 = vld [vmem:[%s1076_s1 + $0x50] sm:$0xff]  }
   0x6   :  { %711 = vmatprep.subr.bf16.mxu1 %v796_v5  ;;  %v804_v13 = vld [vmem:[%s1076_s1 + $0xe0] sm:$0xff]   ;;  %v808_v17 = vld [vmem:[%s1076_s1 + $0xd8] sm:$0xff]   ;;  %v812_v21 = vld [vmem:[%s1076_s1 + $0xd0] sm:$0xff]  }
   0x7   :  { %v805_v14 = vld [vmem:[%s1076_s1 + $0x20] sm:$0xff]   ;;  %v809_v18 = vld [vmem:[%s1076_s1 + $0x18] sm:$0xff]   ;;  %v813_v22 = vld [vmem:[%s1076_s1 + $0x10] sm:$0xff]  }
   0x8   :  { %690 = vmatpush3.bf16.msra.mxu0 %v797_v6  ;;  %v806_v15 = vld [vmem:[%s1076_s1 + $0xa0] sm:$0xff]   ;;  %v810_v19 = vld [vmem:[%s1076_s1 + $0x98] sm:$0xff]   ;;  %v814_v23 = vld [vmem:[%s1076_s1 + $0x90] sm:$0xff]  }
   0x9   :  { %712 = vmatpush3.bf16.msra.mxu1 %v798_v7  ;;  %691 = vmatprep.subr.bf16.mxu0 %v799_v8  ;;  %v815_v24 = vld [vmem:[%s1076_s1 + $0x48] sm:$0xff]   ;;  %v819_v28 = vld [vmem:[%s1076_s1 + $0x40] sm:$0xff]   ;;  %v829_v37 = vld [vmem:[%s1078_s3 + $0x38] sm:$0xff]  }
   0xa   :  { %713 = vmatprep.subr.bf16.mxu1 %v800_v9  ;;  %v816_v25 = vld [vmem:[%s1076_s1 + $0xc8] sm:$0xff]   ;;  %v820_v29 = vld [vmem:[%s1076_s1 + $0xc0] sm:$0xff]   ;;  %v830_v38 = vld [vmem:[%s1078_s3 + $0x30] sm:$0xff]  }
   0xb   :  { %v817_v26 = vld [vmem:[%s1076_s1 + $0x8] sm:$0xff]   ;;  %v821_v30 = vld [vmem:[%s1076_s1] sm:$0xff]   ;;  %v833_v41 = vld [vmem:[%s1078_s3 + $0x18] sm:$0xff]  }
   0xc   :  { %692 = vmatpush3.bf16.msra.mxu0 %v801_v10  ;;  %v818_v27 = vld [vmem:[%s1076_s1 + $0x88] sm:$0xff]   ;;  %v822_v31 = vld [vmem:[%s1076_s1 + $0x80] sm:$0xff]   ;;  %v834_v42 = vld [vmem:[%s1078_s3 + $0x10] sm:$0xff]  }
   0xd   :  { %714 = vmatpush3.bf16.msra.mxu1 %v802_v11  ;;  %693 = vmatprep.subr.bf16.mxu0 %v803_v12  ;;  %v823_v32 = vld [vmem:[%s1077_s0] ss:$16 sps:$4 sm:$0xff]   ;;  %v825_v33 = vld [vmem:[%s1077_s0 + $0x4] ss:$16 sps:$4 sm:$0xff]   ;;  %v826_v35 = vld [vmem:[%s1077_s0 + $0x8] ss:$16 sps:$4 sm:$0xff]  }
   0xe   :  { %715 = vmatprep.subr.bf16.mxu1 %v804_v13  ;;  %v828_v36 = vld [vmem:[%s1077_s0 + $0xc] ss:$16 sps:$4 sm:$0xff]   ;;  %346 = vmatprep.mubr.bf16.mxu0 %v825_v33  ;;  %v832_v40 = vld [vmem:[%s1078_s3 + $0x20] sm:$0xff]   ;;  %v838_v46 = vld [vmem:[%s1079_s5 + $0x30] sm:$0xff]  }
   0xf   :  { %387 = vmatprep.mubr.bf16.mxu1 %v828_v36  ;;  %v831_v39 = vld [vmem:[%s1078_s3 + $0x28] sm:$0xff]   ;;  %v836_v44 = vld [vmem:[%s1078_s3] sm:$0xff]   ;;  %v837_v45 = vld [vmem:[%s1079_s5 + $0x38] sm:$0xff]  }
  0x10   :  { %694 = vmatpush3.bf16.msra.mxu0 %v805_v14  ;;  %v835_v43 = vld [vmem:[%s1078_s3 + $0x8] sm:$0xff]   ;;  %v840_v48 = vld [vmem:[%s1079_s5 + $0x20] sm:$0xff]   ;;  %v841_v49 = vld [vmem:[%s1079_s5 + $0x18] sm:$0xff]  }
  0x11   :  { %716 = vmatpush3.bf16.msra.mxu1 %v806_v15  ;;  %695 = vmatprep.subr.bf16.mxu0 %v807_v16  ;;  %v839_v47 = vld [vmem:[%s1079_s5 + $0x28] sm:$0xff]   ;;  %v632_v52 = vld [vmem:[%s1080_s2] ss:$0 sm:$0xff]  ;;  %v842_v6 = vld [vmem:[%s1079_s5 + $0x10] sm:$0xff]  }
  0x12   :  { %717 = vmatprep.subr.bf16.mxu1 %v808_v17  ;;  %v843_v7 = vld [vmem:[%s1079_s5 + $0x8] sm:$0xff]   ;;  %v844_v8 = vld [vmem:[%s1079_s5] sm:$0xff]  }
  0x13   :  { %v669_v9 = vld [vmem:[%s1081_s4] ss:$0 sm:$0xff] }
  0x14   :  { %696 = vmatpush3.bf16.msra.mxu0 %v809_v18 }
  0x15   :  { %718 = vmatpush3.bf16.msra.mxu1 %v810_v19  ;;  %697 = vmatprep.subr.bf16.mxu0 %v811_v20  ;;  %v678_v19 = vld [vmem:[%s1082_s6] ss:$0 sm:$0xff] }
  0x16   :  { %719 = vmatprep.subr.bf16.mxu1 %v812_v21 }
  0x18   :  { %698 = vmatpush3.bf16.msra.mxu0 %v813_v22 }
  0x19   :  { %720 = vmatpush3.bf16.msra.mxu1 %v814_v23  ;;  %699 = vmatprep.subr.bf16.mxu0 %v815_v24 }
  0x1a   :  { %721 = vmatprep.subr.bf16.mxu1 %v816_v25 }
  0x1c   :  { %700 = vmatpush3.bf16.msra.mxu0 %v817_v26 }
  0x1d   :  { %722 = vmatpush3.bf16.msra.mxu1 %v818_v27  ;;  %701 = vmatprep.subr.bf16.mxu0 %v819_v28 }
  0x1e   :  { %723 = vmatprep.subr.bf16.mxu1 %v820_v29 }
  0x20   :  { %702 = vmatpush3.bf16.msra.mxu0 %v821_v30 }
  0x21   :  { %724 = vmatpush3.bf16.msra.mxu1 %v822_v31  ;;  %749 = vmatprep.subr.bf16.mxu0 %v845_v34 }
  0x22   :  { %769 = vmatprep.subr.bf16.mxu1 %v845_v34 }
  0x23   :  { %347 = vmatmul.mubr.bf16.vlgmr.msra.gmra.mxu0 %v823_v32 }
  0x24   :  { %388 = vmatmul.mubr.bf16.vlgmr.msra.gmra.mxu1 %v826_v35  ;;  %750 = vmatpush3.bf16.msra.mxu0 %v829_v37 }
  0x25   :  { %751 = vmatprep.subr.bf16.mxu0 %v845_v34  ;;  %765 = vmatprep.mubr.msk.bf16.mxu0 %vm846_vm0, %v845_v34 }
  0x26   :  { %785 = vmatprep.mubr.msk.bf16.mxu1 %vm846_vm0, %v845_v34  ;;  %770 = vmatpush3.bf16.msra.mxu1 %v837_v45 }
  0x27   :  { %771 = vmatprep.subr.bf16.mxu1 %v845_v34 }
  0x28   :  { %752 = vmatpush3.bf16.msra.mxu0 %v830_v38 }
  0x29   :  { %753 = vmatprep.subr.bf16.mxu0 %v845_v34 }
  0x2a   :  { %772 = vmatpush3.bf16.msra.mxu1 %v838_v46 }
  0x2b   :  { %773 = vmatprep.subr.bf16.mxu1 %v845_v34 }
  0x2c   :  { %754 = vmatpush3.bf16.msra.mxu0 %v831_v39 }
  0x2d   :  { %755 = vmatprep.subr.bf16.mxu0 %v845_v34 }
  0x2e   :  { %774 = vmatpush3.bf16.msra.mxu1 %v839_v47 }
  0x2f   :  { %775 = vmatprep.subr.bf16.mxu1 %v845_v34 }
  0x30   :  { %756 = vmatpush3.bf16.msra.mxu0 %v832_v40 }
  0x31   :  { %757 = vmatprep.subr.bf16.mxu0 %v845_v34 }
  0x32   :  { %776 = vmatpush3.bf16.msra.mxu1 %v840_v48 }
  0x33   :  { %777 = vmatprep.subr.bf16.mxu1 %v845_v34 }
  0x34   :  { %758 = vmatpush3.bf16.msra.mxu0 %v833_v41 }
  0x35   :  { %759 = vmatprep.subr.bf16.mxu0 %v845_v34 }
  0x36   :  { %778 = vmatpush3.bf16.msra.mxu1 %v841_v49 }
  0x37   :  { %779 = vmatprep.subr.bf16.mxu1 %v845_v34 }
  0x38   :  { %760 = vmatpush3.bf16.msra.mxu0 %v834_v42 }
  0x39   :  { %761 = vmatprep.subr.bf16.mxu0 %v845_v34 }
  0x3a   :  { %780 = vmatpush3.bf16.msra.mxu1 %v842_v6 }
  0x3b   :  { %781 = vmatprep.subr.bf16.mxu1 %v845_v34 }
  0x3c   :  { %762 = vmatpush3.bf16.msra.mxu0 %v835_v43 }
  0x3d   :  { %763 = vmatprep.subr.bf16.mxu0 %v845_v34 }
  0x3e   :  { %782 = vmatpush3.bf16.msra.mxu1 %v843_v7 }
  0x3f   :  { %783 = vmatprep.subr.bf16.mxu1 %v845_v34 }
  0x40   :  { %764 = vmatpush3.bf16.msra.mxu0 %v836_v44 }
  0x42   :  { %784 = vmatpush3.bf16.msra.mxu1 %v844_v8 }
  0xe3   :  { %v703_v50 = vpop.f32.mrf.mxu0 }
  0xe4   :  { %v725_v51 = vpop.f32.mrf.mxu1 }
  0xe5   :  { %v704_v53 = vpop.f32.mrf.mxu0 }
  0xe6   :  { %v705_v54 = vadd.f32 %v704_v53, %v703_v50  ;;  %v726_v55 = vpop.f32.mrf.mxu1 }
  0xe7   :  { %v706_v56 = vpop.f32.mrf.mxu0  ;;  %v727_v60 = vadd.f32 %v726_v55, %v725_v51 }
  0xe8   :  { %v349_v57 = vadd.f32 %v705_v54, %v632_v52  ;;  %v728_v58 = vpop.f32.mrf.mxu1 }
  0xe9   :  { %v707_v59 = vpop.f32.mrf.mxu0 }
  0xea   :  { %v708_v61 = vadd.f32 %v707_v59, %v706_v56  ;;  %v729_v62 = vpop.f32.mrf.mxu1  ;;  %v390_v63 = vadd.f32 %v727_v60, %v349_v57 }
  0xeb   :  { %v730_v1 = vadd.f32 %v729_v62, %v728_v58 }
  0xec   :  { %v352_v0 = vadd.f32 %v708_v61, %v632_v52  ;;  %v396_v3 = vmax.f32 %v390_v63, 0.0 }
  0xee   :  { %v393_v2 = vadd.f32 %v730_v1, %v352_v0 }
  0xf0   :  { %v397_v4 = vmax.f32 %v393_v2, 0.0 }
  0xf2   :  { %v398_v5 = vpack.c.bf16 %v397_v4, %v396_v3 }
  0xf4   :  { %766 = vmatmul.mubr.bf16.vlgmr.msra.gmra.mxu0 %v398_v5 }
 0x1b4   :  { %v504_v10 = vpop.f32.mrf.mxu0 }
 0x1b5   :  { %v505_v12 = vadd.f32 %v669_v9, %v504_v10 }
 0x1b6   :  { %v767_v11 = vpop.f32.mrf.mxu0 }
 0x1b7   :  { %v511_v16 = vmax.f32 %v505_v12, 0.0 }
 0x1b8   :  { %v507_v13 = vpop.f32.mrf.mxu0 }
 0x1b9   :  { %v508_v14 = vadd.f32 %v669_v9, %v507_v13 }
 0x1ba   :  { %v768_v15 = vpop.f32.mrf.mxu0 }
 0x1bb   :  { %v512_v17 = vmax.f32 %v508_v14, 0.0 }
 0x1bd   :  { %v513_v18 = vpack.c.bf16 %v512_v17, %v511_v16 }
 0x1bf   :  { %786 = vmatmul.mubr.bf16.vlgmr.msra.gmra.mxu1 %v513_v18 }
 0x27f   :  { %v619_v20 = vpop.f32.mrf.mxu1 }
 0x280   :  { %v620_v21 = vadd.f32 %v678_v19, %v619_v20 }
 0x281   :  { %v787_v22 = vpop.f32.mrf.mxu1 }
 0x282   :  { %626 = vst [vmem:[%s1083_s7] sm:$0xff] %v620_v21 }
 0x283   :  { %v622_v23 = vpop.f32.mrf.mxu1 }
 0x284   :  { %v623_v24 = vadd.f32 %v678_v19, %v622_v23 }
 0x285   :  { %v788_v25 = vpop.f32.mrf.mxu1 }
 0x286   :  { %627 = vst [vmem:[%s1083_s7 + $0x8] sm:$0xff] %v623_v24 }

</bundles_post_ra>
